<compile_context>
chip_gen: v7x
topology: tpu7x:2x2x1
jax: 0.10.0
libtpu: 0.0.40
codegen_flags: <defaults>
</compile_context>

<pallas_src>
import functools

import jax
import jax.numpy as jnp
from jax import lax
from jax.experimental import pallas as pl
from jax.experimental.pallas import tpu as pltpu

BN_EPS = 1e-5


def bn_fold(gamma, beta, mean, var, eps=BN_EPS):
    """Fold eval-mode batchnorm into per-channel scale & bias."""
    scale = gamma / jnp.sqrt(var + eps)
    bias = beta - mean * scale
    return scale.astype(jnp.float32), bias.astype(jnp.float32)


def _fold_sepconv(dw_w, bn1, pw_w, bn2, activate_first):
    """Fold the two BNs of a SeparableConv2d into its weights.

    Returns (dw_taps (Cin, 9), w (Cout, Cin), out_bias (Cout,), mid_bias (Cin,)).
    """
    s1, b1 = bn_fold(*bn1)
    s2, b2 = bn_fold(*bn2)
    dwm = dw_w.reshape(9, -1).T.astype(jnp.float32)          # (Cin, 9)
    if activate_first:
        # relu -> dw -> bn1 -> pw -> bn2 : bn1 feeds linearly into the 1x1
        # conv, so fold it into the pointwise weight / bias.
        w = pw_w.T * s2[:, None] * s1[None, :]               # (Cout, Cin)
        ob = s2 * (pw_w.T @ b1) + b2
        mb = jnp.zeros(dw_w.shape[-1], jnp.float32)
    else:
        # dw -> bn1 -> relu -> pw -> bn2 -> relu : the relu blocks the bn1
        # fold into pw, so fold bn1's scale into the depthwise taps and keep
        # its bias as a pre-relu "mid" bias.
        dwm = dwm * s1[:, None]
        w = pw_w.T * s2[:, None]
        ob = b2
        mb = b1
    return dwm, w.astype(jnp.float32), ob.astype(jnp.float32), \
        mb.astype(jnp.float32)


# ---------------------------------------------------------------------------
# Fused Block kernel.  One grid step per batch element; all activations are
# kept channel-major (C, H*W) so the lane axis is dense.
# ---------------------------------------------------------------------------
def _block_kernel(x_ref, s_ref, m_ref, dw_ref, b_ref, w1_ref, w2_ref, w3_ref,
                  wsk_ref, o_ref, pad_ref, *, H, W, stride, dils, cins, couts,
                  has_skip, activate_first):
    HW = H * W
    f32 = jnp.float32

    def depthwise(v, idx, cin, d):
        # Flat zero-padded scratch: the H*W pixels sit contiguously with a
        # margin of d*W+d zeros on each side (provides the *vertical* zero
        # padding); the *horizontal* row edges are handled with the
        # precomputed left/right lane masks.
        P = d * W + d
        pad_ref[...] = jnp.zeros_like(pad_ref)
        pad_ref[:cin, P:P + HW] = v

        def col_sum(kx):
            acc = None
            for ky in range(3):
                off = (ky * W + kx) * d
                win = pad_ref[:cin, off:off + HW]             # (cin, HW)
                c = 9 * idx + 3 * ky + kx
                term = win * dw_ref[:cin, c:c + 1]            # per-channel tap
                acc = term if acc is None else acc + term
            return acc

        mask_l = m_ref[2 * idx:2 * idx + 1, :]                # (1, HW)
        mask_r = m_ref[2 * idx + 1:2 * idx + 2, :]
        return col_sum(0) * mask_l + col_sum(1) + col_sum(2) * mask_r

    def sepconv(v, idx, w_ref, subsample):
        cin, cout, d = cins[idx], couts[idx], dils[idx]
        if activate_first:
            v = jnp.maximum(v, 0.0)
        acc = depthwise(v, idx, cin, d)                       # (cin, HW)
        if subsample:                                         # strided conv:
            # keep only the (::s, ::s) output columns (0/1 matmul on the MXU)
            acc = jnp.dot(acc, s_ref[...], preferred_element_type=f32)
        if not activate_first:
            acc = jnp.maximum(acc + b_ref[:cin, 4 + idx:5 + idx], 0.0)
        y = jnp.dot(w_ref[...], acc, preferred_element_type=f32)
        y = y + b_ref[:cout, idx:idx + 1]
        if not activate_first:
            y = jnp.maximum(y, 0.0)
        return y

    x = x_ref[0]                                              # (Cin0, H*W)
    y1 = sepconv(x, 0, w1_ref, False)
    y2 = sepconv(y1, 1, w2_ref, False)                        # == hook_layer
    y3 = sepconv(y2, 2, w3_ref, stride > 1)

    if has_skip:
        xs = x
        if stride > 1:
            xs = jnp.dot(xs, s_ref[...], preferred_element_type=f32)
        skip = jnp.dot(wsk_ref[...], xs, preferred_element_type=f32)
        skip = skip + b_ref[:couts[2], 3:4]
    else:
        skip = x
    o_ref[0] = y3 + skip


def block_forward(x_nchw, params, *, strides, atrous, activate_first):
    """x_nchw: (N, Cin, H, W) float32.  Returns (N, Cout, Ho, Wo)."""
    x = x_nchw.astype(jnp.float32)
    N, Cin, H, W = x.shape
    HW = H * W
    dils = tuple(int(d) for d in atrous)

    folds = [
        _fold_sepconv(params["dw1"], params["bn1a"], params["pw1"],
                      params["bn1b"], activate_first),
        _fold_sepconv(params["dw2"], params["bn2a"], params["pw2"],
                      params["bn2b"], activate_first),
        _fold_sepconv(params["dw3"], params["bn3a"], params["pw3"],
                      params["bn3b"], activate_first),
    ]
    cins = tuple(f[0].shape[0] for f in folds)
    couts = tuple(f[1].shape[0] for f in folds)
    assert cins[0] == Cin
    cmax = max(max(cins), max(couts))
    has_skip = "skip_w" in params

    # Pack the small per-channel operands (depthwise taps + all biases) into
    # two arrays to minimize DMA streams.
    dw_pack = jnp.zeros((cmax, 27), jnp.float32)
    b_pack = jnp.zeros((cmax, 7), jnp.float32)
    for i, (dwm, _, ob, mb) in enumerate(folds):
        dw_pack = dw_pack.at[:cins[i], 9 * i:9 * i + 9].set(dwm)
        b_pack = b_pack.at[:couts[i], i].set(ob)
        b_pack = b_pack.at[:cins[i], 4 + i].set(mb)

    if has_skip:
        ssk, bsk = bn_fold(*params["skip_bn"])
        w_skip = (params["skip_w"].T * ssk[:, None]).astype(jnp.float32)
        b_pack = b_pack.at[:couts[2], 3].set(bsk)
    else:
        w_skip = jnp.zeros((1, 1), jnp.float32)               # unused dummy

    # Horizontal-edge masks for the flat depthwise taps (left/right per conv).
    col = jnp.arange(HW, dtype=jnp.int32) % W
    masks = jnp.stack(
        [m for d in dils
         for m in ((col >= d).astype(jnp.float32),
                   (col < W - d).astype(jnp.float32))])       # (6, HW)

    # Strided output: 0/1 column-selection matrix applied in-kernel (MXU).
    if strides > 1:
        Ho = (H - 1) // strides + 1
        Wo = (W - 1) // strides + 1
        q = jnp.arange(Ho * Wo, dtype=jnp.int32)
        p_sel = (q // Wo) * (strides * W) + (q % Wo) * strides
        sel = (jnp.arange(HW, dtype=jnp.int32)[:, None]
               == p_sel[None, :]).astype(jnp.float32)         # (HW, Ho*Wo)
    else:
        Ho, Wo = H, W
        sel = jnp.zeros((1, 1), jnp.float32)                  # unused dummy
    HWo = Ho * Wo

    l_max = max((H + 2 * d) * W + 2 * d for d in dils)
    x_flat = x.reshape(N, Cin, HW)                            # free reshape

    kernel = functools.partial(
        _block_kernel, H=H, W=W, stride=strides, dils=dils, cins=cins,
        couts=couts, has_skip=has_skip, activate_first=activate_first)

    def full_spec(a):
        nd = a.ndim
        return pl.BlockSpec(tuple(a.shape), lambda n, _nd=nd: (0,) * _nd)

    out = pl.pallas_call(
        kernel,
        out_shape=jax.ShapeDtypeStruct((N, couts[2], HWo), jnp.float32),
        grid=(N,),
        in_specs=[
            pl.BlockSpec((1, Cin, HW), lambda n: (n, 0, 0)),
            full_spec(sel), full_spec(masks), full_spec(dw_pack),
            full_spec(b_pack),
            full_spec(folds[0][1]), full_spec(folds[1][1]),
            full_spec(folds[2][1]), full_spec(w_skip),
        ],
        out_specs=pl.BlockSpec((1, couts[2], HWo), lambda n: (n, 0, 0)),
        scratch_shapes=[pltpu.VMEM((cmax, l_max), jnp.float32)],
        compiler_params=pltpu.CompilerParams(
            dimension_semantics=("parallel",)),
    )(x_flat, sel, masks, dw_pack, b_pack,
      folds[0][1], folds[1][1], folds[2][1], w_skip)

    return out.reshape(N, couts[2], Ho, Wo)


# ---------------------------------------------------------------------------
# Pure-JAX reference (lax convs) used only to validate the Pallas kernel.
# ---------------------------------------------------------------------------
def block_reference(x_nchw, params, *, strides, atrous, activate_first):
    dn = ("NHWC", "HWIO", "NHWC")
    x = jnp.transpose(x_nchw, (0, 2, 3, 1)).astype(jnp.float32)

    def bn(v, p):
        g, b, m, var = p
        return (v - m) / jnp.sqrt(var + BN_EPS) * g + b

    def sep(v, dw, bn1, pw, bn2, stride, d):
        if activate_first:
            v = jnp.maximum(v, 0.0)
        C = v.shape[-1]
        v = lax.conv_general_dilated(
            v, dw[:, :, None, :], (stride, stride), [(d, d), (d, d)],
            rhs_dilation=(d, d), dimension_numbers=dn,
            feature_group_count=C, precision=lax.Precision.HIGHEST)
        v = bn(v, bn1)
        if not activate_first:
            v = jnp.maximum(v, 0.0)
        v = lax.conv_general_dilated(
            v, pw[None, None, :, :], (1, 1), "VALID",
            dimension_numbers=dn, precision=lax.Precision.HIGHEST)
        v = bn(v, bn2)
        if not activate_first:
            v = jnp.maximum(v, 0.0)
        return v

    x1 = sep(x, params["dw1"], params["bn1a"], params["pw1"], params["bn1b"],
             1, atrous[0])
    x2 = sep(x1, params["dw2"], params["bn2a"], params["pw2"], params["bn2b"],
             1, atrous[1])
    x3 = sep(x2, params["dw3"], params["bn3a"], params["pw3"], params["bn3b"],
             strides, atrous[2])

    if "skip_w" in params:
        skip = lax.conv_general_dilated(
            x, params["skip_w"][None, None, :, :], (strides, strides), "VALID",
            dimension_numbers=dn, precision=lax.Precision.HIGHEST)
        skip = bn(skip, params["skip_bn"])
    else:
        skip = x
    return jnp.transpose(x3 + skip, (0, 3, 1, 2))


if __name__ == "__main__":
    key = jax.random.PRNGKey(0)
    keys = iter(jax.random.split(key, 256))

    def nrm(shape, s=0.1):
        return (s * jax.random.normal(next(keys), shape)).astype(jnp.float32)

    def make_bn(c):
        gamma = (1.0 + 0.1 * jax.random.normal(next(keys), (c,))).astype(jnp.float32)
        beta = (0.1 * jax.random.normal(next(keys), (c,))).astype(jnp.float32)
        mean = (0.1 * jax.random.normal(next(keys), (c,))).astype(jnp.float32)
        var = (0.5 + jax.random.uniform(next(keys), (c,))).astype(jnp.float32)
        return (gamma, beta, mean, var)

    def make_params(in_f, out_f, strides, grow_first=True):
        filters = out_f if grow_first else in_f
        p = {
            "dw1": nrm((3, 3, in_f)), "bn1a": make_bn(in_f),
            "pw1": nrm((in_f, filters)), "bn1b": make_bn(filters),
            "dw2": nrm((3, 3, filters)), "bn2a": make_bn(filters),
            "pw2": nrm((filters, out_f)), "bn2b": make_bn(out_f),
            "dw3": nrm((3, 3, out_f)), "bn3a": make_bn(out_f),
            "pw3": nrm((out_f, out_f)), "bn3b": make_bn(out_f),
        }
        if out_f != in_f or strides != 1:
            p["skip_w"] = nrm((in_f, out_f))
            p["skip_bn"] = make_bn(out_f)
        return p

    def check(in_f, out_f, strides, atrous, activate_first, N=2, H=16, W=16):
        params = make_params(in_f, out_f, strides)
        x = jax.random.normal(next(keys), (N, in_f, H, W), dtype=jnp.float32)
        out = jax.block_until_ready(
            block_forward(x, params, strides=strides, atrous=atrous,
                          activate_first=activate_first))
        ref = jax.block_until_ready(
            block_reference(x, params, strides=strides, atrous=atrous,
                            activate_first=activate_first))
        assert out.shape == ref.shape, (out.shape, ref.shape)
        err = float(jnp.max(jnp.abs(out - ref)))
        assert err < 1e-3, f"mismatch vs reference: max abs err = {err}"

    # Block(in=8, out=16, strides=2, atrous=1, grow_first=True,
    #       activate_first=True)  -> exercises skip conv + in-kernel stride.
    check(8, 16, 2, [1, 1, 1], True)
    # Block(in=16, out=16, strides=1, atrous=2, activate_first=False)
    # -> exercises identity skip, dilation=2, relu-after-BN placement.
    check(16, 16, 1, [2, 2, 2], False)

    print("KERNEL_OK")
</pallas_src>

<mosaic_0001>
module attributes {stable_mosaic.version = 11 : i64} {
  func.func @_block_kernel(%arg0: i32, %arg1: memref<1x8x256xf32, #tpu.memory_space<vmem>>, %arg2: memref<256x64xf32, #tpu.memory_space<vmem>>, %arg3: memref<6x256xf32, #tpu.memory_space<vmem>>, %arg4: memref<16x27xf32, #tpu.memory_space<vmem>>, %arg5: memref<16x7xf32, #tpu.memory_space<vmem>>, %arg6: memref<16x8xf32, #tpu.memory_space<vmem>>, %arg7: memref<16x16xf32, #tpu.memory_space<vmem>>, %arg8: memref<16x16xf32, #tpu.memory_space<vmem>>, %arg9: memref<16x8xf32, #tpu.memory_space<vmem>>, %arg10: memref<1x16x64xf32, #tpu.memory_space<vmem>>, %arg11: memref<16x290xf32, #tpu.memory_space<vmem>>) attributes {dimension_semantics = [#tpu.dimension_semantics<parallel>], iteration_bounds = array<i64: 2>, scalar_prefetch = 0 : i64, scratch_operands = 1 : i64, tpu.core_type = #tpu.core_type<tc>, window_params = [{transform_indices = @transform_0, window_bounds = array<i64: 1, 8, 256>}, {pipeline_mode = #tpu.pipeline_mode<synchronous>, transform_indices = @transform_1, window_bounds = array<i64: 256, 64>}, {pipeline_mode = #tpu.pipeline_mode<synchronous>, transform_indices = @transform_2, window_bounds = array<i64: 6, 256>}, {pipeline_mode = #tpu.pipeline_mode<synchronous>, transform_indices = @transform_3, window_bounds = array<i64: 16, 27>}, {pipeline_mode = #tpu.pipeline_mode<synchronous>, transform_indices = @transform_4, window_bounds = array<i64: 16, 7>}, {pipeline_mode = #tpu.pipeline_mode<synchronous>, transform_indices = @transform_5, window_bounds = array<i64: 16, 8>}, {pipeline_mode = #tpu.pipeline_mode<synchronous>, transform_indices = @transform_6, window_bounds = array<i64: 16, 16>}, {pipeline_mode = #tpu.pipeline_mode<synchronous>, transform_indices = @transform_7, window_bounds = array<i64: 16, 16>}, {pipeline_mode = #tpu.pipeline_mode<synchronous>, transform_indices = @transform_8, window_bounds = array<i64: 16, 8>}, {transform_indices = @transform_9, window_bounds = array<i64: 1, 16, 64>}]} {
    %c0 = arith.constant 0 : index
    %c0_0 = arith.constant 0 : index
    %c0_1 = arith.constant 0 : index
    %0 = vector.load %arg1[%c0, %c0_0, %c0_1] : memref<1x8x256xf32, #tpu.memory_space<vmem>>, vector<1x8x256xf32>
    %1 = vector.shape_cast %0 : vector<1x8x256xf32> to vector<8x256xf32>
    %cst = arith.constant 0.000000e+00 : f32
    %2 = vector.broadcast %cst : f32 to vector<8x256xf32>
    %3 = arith.maximumf %1, %2 : vector<8x256xf32>
    %cst_2 = arith.constant 0.000000e+00 : f32
    %4 = vector.broadcast %cst_2 : f32 to vector<16x290xf32>
    %c0_3 = arith.constant 0 : index
    %c0_4 = arith.constant 0 : index
    %5 = vector.load %arg11[%c0_3, %c0_4] : memref<16x290xf32, #tpu.memory_space<vmem>>, vector<16x290xf32>
    tpu.vector_store %arg11[%c0_3, %c0_4], %4 {strides = array<i32>} : memref<16x290xf32, #tpu.memory_space<vmem>>, vector<16x290xf32>,
    %c0_5 = arith.constant 0 : index
    %c17 = arith.constant 17 : index
    %6 = vector.load %arg11[%c0_5, %c17] : memref<16x290xf32, #tpu.memory_space<vmem>>, vector<8x256xf32>
    tpu.vector_store %arg11[%c0_5, %c17], %3 {strides = array<i32>} : memref<16x290xf32, #tpu.memory_space<vmem>>, vector<8x256xf32>,
    %c0_6 = arith.constant 0 : index
    %c0_7 = arith.constant 0 : index
    %7 = vector.load %arg3[%c0_6, %c0_7] : memref<6x256xf32, #tpu.memory_space<vmem>>, vector<1x256xf32>
    %c1 = arith.constant 1 : index
    %c0_8 = arith.constant 0 : index
    %8 = vector.load %arg3[%c1, %c0_8] : memref<6x256xf32, #tpu.memory_space<vmem>>, vector<1x256xf32>
    %c0_9 = arith.constant 0 : index
    %c0_10 = arith.constant 0 : index
    %9 = vector.load %arg11[%c0_9, %c0_10] : memref<16x290xf32, #tpu.memory_space<vmem>>, vector<8x256xf32>
    %c0_11 = arith.constant 0 : index
    %c0_12 = arith.constant 0 : index
    %10 = vector.load %arg4[%c0_11, %c0_12] : memref<16x27xf32, #tpu.memory_space<vmem>>, vector<8x1xf32>
    %11 = vector.broadcast %10 : vector<8x1xf32> to vector<8x256xf32>
    %12 = arith.mulf %9, %11 : vector<8x256xf32>
    %c0_13 = arith.constant 0 : index
    %c16 = arith.constant 16 : index
    %13 = vector.load %arg11[%c0_13, %c16] : memref<16x290xf32, #tpu.memory_space<vmem>>, vector<8x256xf32>
    %c0_14 = arith.constant 0 : index
    %c3 = arith.constant 3 : index
    %14 = vector.load %arg4[%c0_14, %c3] : memref<16x27xf32, #tpu.memory_space<vmem>>, vector<8x1xf32>
    %15 = vector.broadcast %14 : vector<8x1xf32> to vector<8x256xf32>
    %16 = arith.mulf %13, %15 : vector<8x256xf32>
    %17 = arith.addf %12, %16 : vector<8x256xf32>
    %c0_15 = arith.constant 0 : index
    %c32 = arith.constant 32 : index
    %18 = vector.load %arg11[%c0_15, %c32] : memref<16x290xf32, #tpu.memory_space<vmem>>, vector<8x256xf32>
    %c0_16 = arith.constant 0 : index
    %c6 = arith.constant 6 : index
    %19 = vector.load %arg4[%c0_16, %c6] : memref<16x27xf32, #tpu.memory_space<vmem>>, vector<8x1xf32>
    %20 = vector.broadcast %19 : vector<8x1xf32> to vector<8x256xf32>
    %21 = arith.mulf %18, %20 : vector<8x256xf32>
    %22 = arith.addf %17, %21 : vector<8x256xf32>
    %23 = vector.broadcast %7 : vector<1x256xf32> to vector<8x256xf32>
    %24 = arith.mulf %22, %23 : vector<8x256xf32>
    %c0_17 = arith.constant 0 : index
    %c1_18 = arith.constant 1 : index
    %25 = vector.load %arg11[%c0_17, %c1_18] : memref<16x290xf32, #tpu.memory_space<vmem>>, vector<8x256xf32>
    %c0_19 = arith.constant 0 : index
    %c1_20 = arith.constant 1 : index
    %26 = vector.load %arg4[%c0_19, %c1_20] : memref<16x27xf32, #tpu.memory_space<vmem>>, vector<8x1xf32>
    %27 = vector.broadcast %26 : vector<8x1xf32> to vector<8x256xf32>
    %28 = arith.mulf %25, %27 : vector<8x256xf32>
    %c0_21 = arith.constant 0 : index
    %c17_22 = arith.constant 17 : index
    %29 = vector.load %arg11[%c0_21, %c17_22] : memref<16x290xf32, #tpu.memory_space<vmem>>, vector<8x256xf32>
    %c0_23 = arith.constant 0 : index
    %c4 = arith.constant 4 : index
    %30 = vector.load %arg4[%c0_23, %c4] : memref<16x27xf32, #tpu.memory_space<vmem>>, vector<8x1xf32>
    %31 = vector.broadcast %30 : vector<8x1xf32> to vector<8x256xf32>
    %32 = arith.mulf %29, %31 : vector<8x256xf32>
    %33 = arith.addf %28, %32 : vector<8x256xf32>
    %c0_24 = arith.constant 0 : index
    %c33 = arith.constant 33 : index
    %34 = vector.load %arg11[%c0_24, %c33] : memref<16x290xf32, #tpu.memory_space<vmem>>, vector<8x256xf32>
    %c0_25 = arith.constant 0 : index
    %c7 = arith.constant 7 : index
    %35 = vector.load %arg4[%c0_25, %c7] : memref<16x27xf32, #tpu.memory_space<vmem>>, vector<8x1xf32>
    %36 = vector.broadcast %35 : vector<8x1xf32> to vector<8x256xf32>
    %37 = arith.mulf %34, %36 : vector<8x256xf32>
    %38 = arith.addf %33, %37 : vector<8x256xf32>
    %39 = arith.addf %24, %38 : vector<8x256xf32>
    %c0_26 = arith.constant 0 : index
    %c2 = arith.constant 2 : index
    %40 = vector.load %arg11[%c0_26, %c2] : memref<16x290xf32, #tpu.memory_space<vmem>>, vector<8x256xf32>
    %c0_27 = arith.constant 0 : index
    %c2_28 = arith.constant 2 : index
    %41 = vector.load %arg4[%c0_27, %c2_28] : memref<16x27xf32, #tpu.memory_space<vmem>>, vector<8x1xf32>
    %42 = vector.broadcast %41 : vector<8x1xf32> to vector<8x256xf32>
    %43 = arith.mulf %40, %42 : vector<8x256xf32>
    %c0_29 = arith.constant 0 : index
    %c18 = arith.constant 18 : index
    %44 = vector.load %arg11[%c0_29, %c18] : memref<16x290xf32, #tpu.memory_space<vmem>>, vector<8x256xf32>
    %c0_30 = arith.constant 0 : index
    %c5 = arith.constant 5 : index
    %45 = vector.load %arg4[%c0_30, %c5] : memref<16x27xf32, #tpu.memory_space<vmem>>, vector<8x1xf32>
    %46 = vector.broadcast %45 : vector<8x1xf32> to vector<8x256xf32>
    %47 = arith.mulf %44, %46 : vector<8x256xf32>
    %48 = arith.addf %43, %47 : vector<8x256xf32>
    %c0_31 = arith.constant 0 : index
    %c34 = arith.constant 34 : index
    %49 = vector.load %arg11[%c0_31, %c34] : memref<16x290xf32, #tpu.memory_space<vmem>>, vector<8x256xf32>
    %c0_32 = arith.constant 0 : index
    %c8 = arith.constant 8 : index
    %50 = vector.load %arg4[%c0_32, %c8] : memref<16x27xf32, #tpu.memory_space<vmem>>, vector<8x1xf32>
    %51 = vector.broadcast %50 : vector<8x1xf32> to vector<8x256xf32>
    %52 = arith.mulf %49, %51 : vector<8x256xf32>
    %53 = arith.addf %48, %52 : vector<8x256xf32>
    %54 = vector.broadcast %8 : vector<1x256xf32> to vector<8x256xf32>
    %55 = arith.mulf %53, %54 : vector<8x256xf32>
    %56 = arith.addf %39, %55 : vector<8x256xf32>
    %c0_33 = arith.constant 0 : index
    %c0_34 = arith.constant 0 : index
    %57 = vector.load %arg6[%c0_33, %c0_34] : memref<16x8xf32, #tpu.memory_space<vmem>>, vector<16x8xf32>
    %cst_35 = arith.constant dense<0.000000e+00> : vector<16x256xf32>
    %58 = tpu.matmul %57, %56, %cst_35 {dimension_numbers = #tpu.dot_dimension_numbers<[1], [0], [0], [1], [0, 0, 1, 1], [], []>} : vector<16x8xf32>, vector<8x256xf32>, vector<16x256xf32> -> vector<16x256xf32>
    %c0_36 = arith.constant 0 : index
    %c0_37 = arith.constant 0 : index
    %59 = vector.load %arg5[%c0_36, %c0_37] : memref<16x7xf32, #tpu.memory_space<vmem>>, vector<16x1xf32>
    %60 = vector.broadcast %59 : vector<16x1xf32> to vector<16x256xf32>
    %61 = arith.addf %58, %60 : vector<16x256xf32>
    %cst_38 = arith.constant 0.000000e+00 : f32
    %62 = vector.broadcast %cst_38 : f32 to vector<16x256xf32>
    %63 = arith.maximumf %61, %62 : vector<16x256xf32>
    %cst_39 = arith.constant 0.000000e+00 : f32
    %64 = vector.broadcast %cst_39 : f32 to vector<16x290xf32>
    %c0_40 = arith.constant 0 : index
    %c0_41 = arith.constant 0 : index
    %65 = vector.load %arg11[%c0_40, %c0_41] : memref<16x290xf32, #tpu.memory_space<vmem>>, vector<16x290xf32>
    tpu.vector_store %arg11[%c0_40, %c0_41], %64 {strides = array<i32>} : memref<16x290xf32, #tpu.memory_space<vmem>>, vector<16x290xf32>,
    %c0_42 = arith.constant 0 : index
    %c17_43 = arith.constant 17 : index
    %66 = vector.load %arg11[%c0_42, %c17_43] : memref<16x290xf32, #tpu.memory_space<vmem>>, vector<16x256xf32>
    tpu.vector_store %arg11[%c0_42, %c17_43], %63 {strides = array<i32>} : memref<16x290xf32, #tpu.memory_space<vmem>>, vector<16x256xf32>,
    %c2_44 = arith.constant 2 : index
    %c0_45 = arith.constant 0 : index
    %67 = vector.load %arg3[%c2_44, %c0_45] : memref<6x256xf32, #tpu.memory_space<vmem>>, vector<1x256xf32>
    %c3_46 = arith.constant 3 : index
    %c0_47 = arith.constant 0 : index
    %68 = vector.load %arg3[%c3_46, %c0_47] : memref<6x256xf32, #tpu.memory_space<vmem>>, vector<1x256xf32>
    %c0_48 = arith.constant 0 : index
    %c0_49 = arith.constant 0 : index
    %69 = vector.load %arg11[%c0_48, %c0_49] : memref<16x290xf32, #tpu.memory_space<vmem>>, vector<16x256xf32>
    %c0_50 = arith.constant 0 : index
    %c9 = arith.constant 9 : index
    %70 = vector.load %arg4[%c0_50, %c9] : memref<16x27xf32, #tpu.memory_space<vmem>>, vector<16x1xf32>
    %71 = vector.broadcast %70 : vector<16x1xf32> to vector<16x256xf32>
    %72 = arith.mulf %69, %71 : vector<16x256xf32>
    %c0_51 = arith.constant 0 : index
    %c16_52 = arith.constant 16 : index
    %73 = vector.load %arg11[%c0_51, %c16_52] : memref<16x290xf32, #tpu.memory_space<vmem>>, vector<16x256xf32>
    %c0_53 = arith.constant 0 : index
    %c12 = arith.constant 12 : index
    %74 = vector.load %arg4[%c0_53, %c12] : memref<16x27xf32, #tpu.memory_space<vmem>>, vector<16x1xf32>
    %75 = vector.broadcast %74 : vector<16x1xf32> to vector<16x256xf32>
    %76 = arith.mulf %73, %75 : vector<16x256xf32>
    %77 = arith.addf %72, %76 : vector<16x256xf32>
    %c0_54 = arith.constant 0 : index
    %c32_55 = arith.constant 32 : index
    %78 = vector.load %arg11[%c0_54, %c32_55] : memref<16x290xf32, #tpu.memory_space<vmem>>, vector<16x256xf32>
    %c0_56 = arith.constant 0 : index
    %c15 = arith.constant 15 : index
    %79 = vector.load %arg4[%c0_56, %c15] : memref<16x27xf32, #tpu.memory_space<vmem>>, vector<16x1xf32>
    %80 = vector.broadcast %79 : vector<16x1xf32> to vector<16x256xf32>
    %81 = arith.mulf %78, %80 : vector<16x256xf32>
    %82 = arith.addf %77, %81 : vector<16x256xf32>
    %83 = vector.broadcast %67 : vector<1x256xf32> to vector<16x256xf32>
    %84 = arith.mulf %82, %83 : vector<16x256xf32>
    %c0_57 = arith.constant 0 : index
    %c1_58 = arith.constant 1 : index
    %85 = vector.load %arg11[%c0_57, %c1_58] : memref<16x290xf32, #tpu.memory_space<vmem>>, vector<16x256xf32>
    %c0_59 = arith.constant 0 : index
    %c10 = arith.constant 10 : index
    %86 = vector.load %arg4[%c0_59, %c10] : memref<16x27xf32, #tpu.memory_space<vmem>>, vector<16x1xf32>
    %87 = vector.broadcast %86 : vector<16x1xf32> to vector<16x256xf32>
    %88 = arith.mulf %85, %87 : vector<16x256xf32>
    %c0_60 = arith.constant 0 : index
    %c17_61 = arith.constant 17 : index
    %89 = vector.load %arg11[%c0_60, %c17_61] : memref<16x290xf32, #tpu.memory_space<vmem>>, vector<16x256xf32>
    %c0_62 = arith.constant 0 : index
    %c13 = arith.constant 13 : index
    %90 = vector.load %arg4[%c0_62, %c13] : memref<16x27xf32, #tpu.memory_space<vmem>>, vector<16x1xf32>
    %91 = vector.broadcast %90 : vector<16x1xf32> to vector<16x256xf32>
    %92 = arith.mulf %89, %91 : vector<16x256xf32>
    %93 = arith.addf %88, %92 : vector<16x256xf32>
    %c0_63 = arith.constant 0 : index
    %c33_64 = arith.constant 33 : index
    %94 = vector.load %arg11[%c0_63, %c33_64] : memref<16x290xf32, #tpu.memory_space<vmem>>, vector<16x256xf32>
    %c0_65 = arith.constant 0 : index
    %c16_66 = arith.constant 16 : index
    %95 = vector.load %arg4[%c0_65, %c16_66] : memref<16x27xf32, #tpu.memory_space<vmem>>, vector<16x1xf32>
    %96 = vector.broadcast %95 : vector<16x1xf32> to vector<16x256xf32>
    %97 = arith.mulf %94, %96 : vector<16x256xf32>
    %98 = arith.addf %93, %97 : vector<16x256xf32>
    %99 = arith.addf %84, %98 : vector<16x256xf32>
    %c0_67 = arith.constant 0 : index
    %c2_68 = arith.constant 2 : index
    %100 = vector.load %arg11[%c0_67, %c2_68] : memref<16x290xf32, #tpu.memory_space<vmem>>, vector<16x256xf32>
    %c0_69 = arith.constant 0 : index
    %c11 = arith.constant 11 : index
    %101 = vector.load %arg4[%c0_69, %c11] : memref<16x27xf32, #tpu.memory_space<vmem>>, vector<16x1xf32>
    %102 = vector.broadcast %101 : vector<16x1xf32> to vector<16x256xf32>
    %103 = arith.mulf %100, %102 : vector<16x256xf32>
    %c0_70 = arith.constant 0 : index
    %c18_71 = arith.constant 18 : index
    %104 = vector.load %arg11[%c0_70, %c18_71] : memref<16x290xf32, #tpu.memory_space<vmem>>, vector<16x256xf32>
    %c0_72 = arith.constant 0 : index
    %c14 = arith.constant 14 : index
    %105 = vector.load %arg4[%c0_72, %c14] : memref<16x27xf32, #tpu.memory_space<vmem>>, vector<16x1xf32>
    %106 = vector.broadcast %105 : vector<16x1xf32> to vector<16x256xf32>
    %107 = arith.mulf %104, %106 : vector<16x256xf32>
    %108 = arith.addf %103, %107 : vector<16x256xf32>
    %c0_73 = arith.constant 0 : index
    %c34_74 = arith.constant 34 : index
    %109 = vector.load %arg11[%c0_73, %c34_74] : memref<16x290xf32, #tpu.memory_space<vmem>>, vector<16x256xf32>
    %c0_75 = arith.constant 0 : index
    %c17_76 = arith.constant 17 : index
    %110 = vector.load %arg4[%c0_75, %c17_76] : memref<16x27xf32, #tpu.memory_space<vmem>>, vector<16x1xf32>
    %111 = vector.broadcast %110 : vector<16x1xf32> to vector<16x256xf32>
    %112 = arith.mulf %109, %111 : vector<16x256xf32>
    %113 = arith.addf %108, %112 : vector<16x256xf32>
    %114 = vector.broadcast %68 : vector<1x256xf32> to vector<16x256xf32>
    %115 = arith.mulf %113, %114 : vector<16x256xf32>
    %116 = arith.addf %99, %115 : vector<16x256xf32>
    %c0_77 = arith.constant 0 : index
    %c0_78 = arith.constant 0 : index
    %117 = vector.load %arg7[%c0_77, %c0_78] : memref<16x16xf32, #tpu.memory_space<vmem>>, vector<16x16xf32>
    %cst_79 = arith.constant dense<0.000000e+00> : vector<16x256xf32>
    %118 = tpu.matmul %117, %116, %cst_79 {dimension_numbers = #tpu.dot_dimension_numbers<[1], [0], [0], [1], [0, 0, 1, 1], [], []>} : vector<16x16xf32>, vector<16x256xf32>, vector<16x256xf32> -> vector<16x256xf32>
    %c0_80 = arith.constant 0 : index
    %c1_81 = arith.constant 1 : index
    %119 = vector.load %arg5[%c0_80, %c1_81] : memref<16x7xf32, #tpu.memory_space<vmem>>, vector<16x1xf32>
    %120 = vector.broadcast %119 : vector<16x1xf32> to vector<16x256xf32>
    %121 = arith.addf %118, %120 : vector<16x256xf32>
    %cst_82 = arith.constant 0.000000e+00 : f32
    %122 = vector.broadcast %cst_82 : f32 to vector<16x256xf32>
    %123 = arith.maximumf %121, %122 : vector<16x256xf32>
    %cst_83 = arith.constant 0.000000e+00 : f32
    %124 = vector.broadcast %cst_83 : f32 to vector<16x290xf32>
    %c0_84 = arith.constant 0 : index
    %c0_85 = arith.constant 0 : index
    %125 = vector.load %arg11[%c0_84, %c0_85] : memref<16x290xf32, #tpu.memory_space<vmem>>, vector<16x290xf32>
    tpu.vector_store %arg11[%c0_84, %c0_85], %124 {strides = array<i32>} : memref<16x290xf32, #tpu.memory_space<vmem>>, vector<16x290xf32>,
    %c0_86 = arith.constant 0 : index
    %c17_87 = arith.constant 17 : index
    %126 = vector.load %arg11[%c0_86, %c17_87] : memref<16x290xf32, #tpu.memory_space<vmem>>, vector<16x256xf32>
    tpu.vector_store %arg11[%c0_86, %c17_87], %123 {strides = array<i32>} : memref<16x290xf32, #tpu.memory_space<vmem>>, vector<16x256xf32>,
    %c4_88 = arith.constant 4 : index
    %c0_89 = arith.constant 0 : index
    %127 = vector.load %arg3[%c4_88, %c0_89] : memref<6x256xf32, #tpu.memory_space<vmem>>, vector<1x256xf32>
    %c5_90 = arith.constant 5 : index
    %c0_91 = arith.constant 0 : index
    %128 = vector.load %arg3[%c5_90, %c0_91] : memref<6x256xf32, #tpu.memory_space<vmem>>, vector<1x256xf32>
    %c0_92 = arith.constant 0 : index
    %c0_93 = arith.constant 0 : index
    %129 = vector.load %arg11[%c0_92, %c0_93] : memref<16x290xf32, #tpu.memory_space<vmem>>, vector<16x256xf32>
    %c0_94 = arith.constant 0 : index
    %c18_95 = arith.constant 18 : index
    %130 = vector.load %arg4[%c0_94, %c18_95] : memref<16x27xf32, #tpu.memory_space<vmem>>, vector<16x1xf32>
    %131 = vector.broadcast %130 : vector<16x1xf32> to vector<16x256xf32>
    %132 = arith.mulf %129, %131 : vector<16x256xf32>
    %c0_96 = arith.constant 0 : index
    %c16_97 = arith.constant 16 : index
    %133 = vector.load %arg11[%c0_96, %c16_97] : memref<16x290xf32, #tpu.memory_space<vmem>>, vector<16x256xf32>
    %c0_98 = arith.constant 0 : index
    %c21 = arith.constant 21 : index
    %134 = vector.load %arg4[%c0_98, %c21] : memref<16x27xf32, #tpu.memory_space<vmem>>, vector<16x1xf32>
    %135 = vector.broadcast %134 : vector<16x1xf32> to vector<16x256xf32>
    %136 = arith.mulf %133, %135 : vector<16x256xf32>
    %137 = arith.addf %132, %136 : vector<16x256xf32>
    %c0_99 = arith.constant 0 : index
    %c32_100 = arith.constant 32 : index
    %138 = vector.load %arg11[%c0_99, %c32_100] : memref<16x290xf32, #tpu.memory_space<vmem>>, vector<16x256xf32>
    %c0_101 = arith.constant 0 : index
    %c24 = arith.constant 24 : index
    %139 = vector.load %arg4[%c0_101, %c24] : memref<16x27xf32, #tpu.memory_space<vmem>>, vector<16x1xf32>
    %140 = vector.broadcast %139 : vector<16x1xf32> to vector<16x256xf32>
    %141 = arith.mulf %138, %140 : vector<16x256xf32>
    %142 = arith.addf %137, %141 : vector<16x256xf32>
    %143 = vector.broadcast %127 : vector<1x256xf32> to vector<16x256xf32>
    %144 = arith.mulf %142, %143 : vector<16x256xf32>
    %c0_102 = arith.constant 0 : index
    %c1_103 = arith.constant 1 : index
    %145 = vector.load %arg11[%c0_102, %c1_103] : memref<16x290xf32, #tpu.memory_space<vmem>>, vector<16x256xf32>
    %c0_104 = arith.constant 0 : index
    %c19 = arith.constant 19 : index
    %146 = vector.load %arg4[%c0_104, %c19] : memref<16x27xf32, #tpu.memory_space<vmem>>, vector<16x1xf32>
    %147 = vector.broadcast %146 : vector<16x1xf32> to vector<16x256xf32>
    %148 = arith.mulf %145, %147 : vector<16x256xf32>
    %c0_105 = arith.constant 0 : index
    %c17_106 = arith.constant 17 : index
    %149 = vector.load %arg11[%c0_105, %c17_106] : memref<16x290xf32, #tpu.memory_space<vmem>>, vector<16x256xf32>
    %c0_107 = arith.constant 0 : index
    %c22 = arith.constant 22 : index
    %150 = vector.load %arg4[%c0_107, %c22] : memref<16x27xf32, #tpu.memory_space<vmem>>, vector<16x1xf32>
    %151 = vector.broadcast %150 : vector<16x1xf32> to vector<16x256xf32>
    %152 = arith.mulf %149, %151 : vector<16x256xf32>
    %153 = arith.addf %148, %152 : vector<16x256xf32>
    %c0_108 = arith.constant 0 : index
    %c33_109 = arith.constant 33 : index
    %154 = vector.load %arg11[%c0_108, %c33_109] : memref<16x290xf32, #tpu.memory_space<vmem>>, vector<16x256xf32>
    %c0_110 = arith.constant 0 : index
    %c25 = arith.constant 25 : index
    %155 = vector.load %arg4[%c0_110, %c25] : memref<16x27xf32, #tpu.memory_space<vmem>>, vector<16x1xf32>
    %156 = vector.broadcast %155 : vector<16x1xf32> to vector<16x256xf32>
    %157 = arith.mulf %154, %156 : vector<16x256xf32>
    %158 = arith.addf %153, %157 : vector<16x256xf32>
    %159 = arith.addf %144, %158 : vector<16x256xf32>
    %c0_111 = arith.constant 0 : index
    %c2_112 = arith.constant 2 : index
    %160 = vector.load %arg11[%c0_111, %c2_112] : memref<16x290xf32, #tpu.memory_space<vmem>>, vector<16x256xf32>
    %c0_113 = arith.constant 0 : index
    %c20 = arith.constant 20 : index
    %161 = vector.load %arg4[%c0_113, %c20] : memref<16x27xf32, #tpu.memory_space<vmem>>, vector<16x1xf32>
    %162 = vector.broadcast %161 : vector<16x1xf32> to vector<16x256xf32>
    %163 = arith.mulf %160, %162 : vector<16x256xf32>
    %c0_114 = arith.constant 0 : index
    %c18_115 = arith.constant 18 : index
    %164 = vector.load %arg11[%c0_114, %c18_115] : memref<16x290xf32, #tpu.memory_space<vmem>>, vector<16x256xf32>
    %c0_116 = arith.constant 0 : index
    %c23 = arith.constant 23 : index
    %165 = vector.load %arg4[%c0_116, %c23] : memref<16x27xf32, #tpu.memory_space<vmem>>, vector<16x1xf32>
    %166 = vector.broadcast %165 : vector<16x1xf32> to vector<16x256xf32>
    %167 = arith.mulf %164, %166 : vector<16x256xf32>
    %168 = arith.addf %163, %167 : vector<16x256xf32>
    %c0_117 = arith.constant 0 : index
    %c34_118 = arith.constant 34 : index
    %169 = vector.load %arg11[%c0_117, %c34_118] : memref<16x290xf32, #tpu.memory_space<vmem>>, vector<16x256xf32>
    %c0_119 = arith.constant 0 : index
    %c26 = arith.constant 26 : index
    %170 = vector.load %arg4[%c0_119, %c26] : memref<16x27xf32, #tpu.memory_space<vmem>>, vector<16x1xf32>
    %171 = vector.broadcast %170 : vector<16x1xf32> to vector<16x256xf32>
    %172 = arith.mulf %169, %171 : vector<16x256xf32>
    %173 = arith.addf %168, %172 : vector<16x256xf32>
    %174 = vector.broadcast %128 : vector<1x256xf32> to vector<16x256xf32>
    %175 = arith.mulf %173, %174 : vector<16x256xf32>
    %176 = arith.addf %159, %175 : vector<16x256xf32>
    %c0_120 = arith.constant 0 : index
    %c0_121 = arith.constant 0 : index
    %177 = vector.load %arg2[%c0_120, %c0_121] : memref<256x64xf32, #tpu.memory_space<vmem>>, vector<256x64xf32>
    %cst_122 = arith.constant dense<0.000000e+00> : vector<16x64xf32>
    %178 = tpu.matmul %176, %177, %cst_122 {dimension_numbers = #tpu.dot_dimension_numbers<[1], [0], [0], [1], [0, 0, 1, 1], [], []>} : vector<16x256xf32>, vector<256x64xf32>, vector<16x64xf32> -> vector<16x64xf32>
    %c0_123 = arith.constant 0 : index
    %c0_124 = arith.constant 0 : index
    %179 = vector.load %arg8[%c0_123, %c0_124] : memref<16x16xf32, #tpu.memory_space<vmem>>, vector<16x16xf32>
    %cst_125 = arith.constant dense<0.000000e+00> : vector<16x64xf32>
    %180 = tpu.matmul %179, %178, %cst_125 {dimension_numbers = #tpu.dot_dimension_numbers<[1], [0], [0], [1], [0, 0, 1, 1], [], []>} : vector<16x16xf32>, vector<16x64xf32>, vector<16x64xf32> -> vector<16x64xf32>
    %c0_126 = arith.constant 0 : index
    %c2_127 = arith.constant 2 : index
    %181 = vector.load %arg5[%c0_126, %c2_127] : memref<16x7xf32, #tpu.memory_space<vmem>>, vector<16x1xf32>
    %182 = vector.broadcast %181 : vector<16x1xf32> to vector<16x64xf32>
    %183 = arith.addf %180, %182 : vector<16x64xf32>
    %c0_128 = arith.constant 0 : index
    %c0_129 = arith.constant 0 : index
    %184 = vector.load %arg2[%c0_128, %c0_129] : memref<256x64xf32, #tpu.memory_space<vmem>>, vector<256x64xf32>
    %cst_130 = arith.constant dense<0.000000e+00> : vector<8x64xf32>
    %185 = tpu.matmul %1, %184, %cst_130 {dimension_numbers = #tpu.dot_dimension_numbers<[1], [0], [0], [1], [0, 0, 1, 1], [], []>} : vector<8x256xf32>, vector<256x64xf32>, vector<8x64xf32> -> vector<8x64xf32>
    %c0_131 = arith.constant 0 : index
    %c0_132 = arith.constant 0 : index
    %186 = vector.load %arg9[%c0_131, %c0_132] : memref<16x8xf32, #tpu.memory_space<vmem>>, vector<16x8xf32>
    %cst_133 = arith.constant dense<0.000000e+00> : vector<16x64xf32>
    %187 = tpu.matmul %186, %185, %cst_133 {dimension_numbers = #tpu.dot_dimension_numbers<[1], [0], [0], [1], [0, 0, 1, 1], [], []>} : vector<16x8xf32>, vector<8x64xf32>, vector<16x64xf32> -> vector<16x64xf32>
    %c0_134 = arith.constant 0 : index
    %c3_135 = arith.constant 3 : index
    %188 = vector.load %arg5[%c0_134, %c3_135] : memref<16x7xf32, #tpu.memory_space<vmem>>, vector<16x1xf32>
    %189 = vector.broadcast %188 : vector<16x1xf32> to vector<16x64xf32>
    %190 = arith.addf %187, %189 : vector<16x64xf32>
    %191 = arith.addf %183, %190 : vector<16x64xf32>
    %c0_136 = arith.constant 0 : index
    %c0_137 = arith.constant 0 : index
    %c0_138 = arith.constant 0 : index
    %192 = vector.load %arg10[%c0_136, %c0_137, %c0_138] : memref<1x16x64xf32, #tpu.memory_space<vmem>>, vector<1x16x64xf32>
    %193 = vector.shape_cast %192 : vector<1x16x64xf32> to vector<16x64xf32>
    %194 = vector.shape_cast %191 : vector<16x64xf32> to vector<1x16x64xf32>
    tpu.vector_store %arg10[%c0_136, %c0_137, %c0_138], %194 {strides = array<i32>} : memref<1x16x64xf32, #tpu.memory_space<vmem>>, vector<1x16x64xf32>,
    return
  }
  func.func @transform_0(%arg0: i32) -> (i32, i32, i32) {
    %c0_i32 = arith.constant 0 : i32
    %c0_i32_0 = arith.constant 0 : i32
    %c0_i32_1 = arith.constant 0 : i32
    return %arg0, %c0_i32, %c0_i32_0 : i32, i32, i32
  }
  func.func @transform_1(%arg0: i32) -> (i32, i32) {
    %c0_i32 = arith.constant 0 : i32
    %c0_i32_0 = arith.constant 0 : i32
    %c0_i32_1 = arith.constant 0 : i32
    return %c0_i32, %c0_i32_0 : i32, i32
  }
  func.func @transform_2(%arg0: i32) -> (i32, i32) {
    %c0_i32 = arith.constant 0 : i32
    %c0_i32_0 = arith.constant 0 : i32
    %c0_i32_1 = arith.constant 0 : i32
    return %c0_i32, %c0_i32_0 : i32, i32
  }
  func.func @transform_3(%arg0: i32) -> (i32, i32) {
    %c0_i32 = arith.constant 0 : i32
    %c0_i32_0 = arith.constant 0 : i32
    %c0_i32_1 = arith.constant 0 : i32
    return %c0_i32, %c0_i32_0 : i32, i32
  }
  func.func @transform_4(%arg0: i32) -> (i32, i32) {
    %c0_i32 = arith.constant 0 : i32
    %c0_i32_0 = arith.constant 0 : i32
    %c0_i32_1 = arith.constant 0 : i32
    return %c0_i32, %c0_i32_0 : i32, i32
  }
  func.func @transform_5(%arg0: i32) -> (i32, i32) {
    %c0_i32 = arith.constant 0 : i32
    %c0_i32_0 = arith.constant 0 : i32
    %c0_i32_1 = arith.constant 0 : i32
    return %c0_i32, %c0_i32_0 : i32, i32
  }
  func.func @transform_6(%arg0: i32) -> (i32, i32) {
    %c0_i32 = arith.constant 0 : i32
    %c0_i32_0 = arith.constant 0 : i32
    %c0_i32_1 = arith.constant 0 : i32
    return %c0_i32, %c0_i32_0 : i32, i32
  }
  func.func @transform_7(%arg0: i32) -> (i32, i32) {
    %c0_i32 = arith.constant 0 : i32
    %c0_i32_0 = arith.constant 0 : i32
    %c0_i32_1 = arith.constant 0 : i32
    return %c0_i32, %c0_i32_0 : i32, i32
  }
  func.func @transform_8(%arg0: i32) -> (i32, i32) {
    %c0_i32 = arith.constant 0 : i32
    %c0_i32_0 = arith.constant 0 : i32
    %c0_i32_1 = arith.constant 0 : i32
    return %c0_i32, %c0_i32_0 : i32, i32
  }
  func.func @transform_9(%arg0: i32) -> (i32, i32, i32) {
    %c0_i32 = arith.constant 0 : i32
    %c0_i32_0 = arith.constant 0 : i32
    %c0_i32_1 = arith.constant 0 : i32
    return %arg0, %c0_i32, %c0_i32_0 : i32, i32, i32
  }
}

</mosaic_0001>

<bundles_post_ra>
// kernel: tpu_custom_call.1
= control target key start
LH: loop header
LB: loop body
LE: loop exit
PB: predicated region body
PF: predicated region fallthrough
CT: control target
= control target key end

     0   :  { %14 = vsyncpa [#allocation4], 0  ;;  %s3521_s0 = inlined_call_operand.vmem [shape: f32[2,8,256], index: 0, kind: input, shape index: {}]   ;;  %s3522_s1 = inlined_call_operand.vmem [shape: f32[256,64], index: 1, kind: input, shape index: {}]   ;;  %s3523_s2 = inlined_call_operand.vmem [shape: f32[6,256], index: 2, kind: input, shape index: {}]   ;;  %s3524_s3 = inlined_call_operand.vmem [shape: f32[16,27], index: 3, kind: input, shape index: {}]   ;;  %s3525_s4 = inlined_call_operand.vmem [shape: f32[16,7], index: 4, kind: input, shape index: {}]   ;;  %s3526_s5 = inlined_call_operand.vmem [shape: f32[16,8], index: 5, kind: input, shape index: {}]   ;;  %s3527_s6 = inlined_call_operand.vmem [shape: f32[16,16], index: 6, kind: input, shape index: {}]   ;;  %s3528_s7 = inlined_call_operand.vmem [shape: f32[16,16], index: 7, kind: input, shape index: {}]   ;;  %s3529_s8 = inlined_call_operand.vmem [shape: f32[16,8], index: 8, kind: input, shape index: {}]   ;;  %s3530_s9 = inlined_call_operand.hbm [shape: f32[2,16,64], index: 9, kind: output, shape index: {}]  }
   0x1   :  { %16 = vsyncpa [#allocation4 + $0x1], 0  ;;  %s2655_s30 = smov 0   ;;  %s2657_s10 = smov 0  }
   0x2   :  { %s2659_s11 = smov 0   ;;  %s2661_s12 = smov 0  }
   0x3 LB: > { %s2676_s13 = sadd.s32 4294967295, %s2566_s12   ;;  %s2179_s14 = sadd.s32 4294967294, %s2566_s12   ;;  %s2566_s12 = sphi %s2661_s12, %s3542_s12   ;;  %s2562_s11 = sphi %s2659_s11, %s3541_s11   ;;  %s2558_s10 = sphi %s2657_s10, %s3540_s10   ;;  %s2554_s30 = sphi %s2655_s30, %s3539_s30  }
   0x4   : > { %s2680_s15 = sadd.s32 1, %s2566_s12   ;;  %s223_s16 = sadd.s32 1, %s2562_s11 }
   0x5   : > { %s220_s17 = ssub.s32 %s2566_s12, %s2680_s15  ;;  %p233_p0 = scmp.ne.s32.totalorder %s2562_s11, %s2558_s10 }
   0x6   : > { %p221_p1 = scmp.eq.s32.totalorder %s220_s17, 0  ;;  %p234_p2 = scmp.eq.s32.totalorder %s2676_s13, 1 }
   0x7   : > { %p239_p3 = scmp.ne.s32.totalorder %s2558_s10, %s2554_s30  ;;  %p240_p4 = scmp.eq.s32.totalorder %s2179_s14, 1 }
   0x8   : > { %s2691_s18 = scalar_select %p221_p1, %s2562_s11, %s223_s16  }
   0x9   : > { %p2693_p5 = por %p234_p2, %p233_p0  ;;  %p2697_p6 = por %p240_p4, %p239_p3 }
   0xa   : > { %p2182_p7 = scmp.ge.s32.totalorder %s2566_s12, 1  ;;  %p290_p8 = scmp.lt.s32.totalorder %s2566_s12, 3 }
   0xc   : > { %p291_p9 = pnand %p2182_p7, %p290_p8 }
   0xd   : > { %v2706_v0 = vld [vmem:[%s3524_s3] sm:$0xff] (!%p291_p9)  ;;  %p326_p10 = scmp.lt.s32.totalorder (!%p291_p9), %s2676_s13, 1  ;;  %v2568_v1 = vmov (!%p291_p9), 4   ;;  %v2569_v2 = vmov (!%p291_p9), 7   ;;  %vm337_vm0 = vcmask (!%p291_p9), 277504   ;;  %v2570_v3 = vmov (!%p291_p9), 0.0  }
   0xe   : > { %294 = sbr.rel (%p291_p9) target bundleno = 2159 (0x86f), region = 56  ;;  %2451 = vset.pattern.permute.xlu1 (!%p291_p9), %v2568_v1  ;;  %2453 = vset.pattern.permute.xlu0 (!%p291_p9), %v2569_v2  ;;  %335 = vst [vmem:[#allocation2] sm:$0xff] (!%p291_p9), %v2570_v3  ;;  %338 = vst.msk [vmem:[#allocation2 + $0x10] sm:$0xff] (!%p291_p9), %vm337_vm0, %v2570_v3  ;;  %v2571_v4 = vmov (!%p291_p9), 5   ;;  %s2572_s28 = smov (!%p291_p9), 17   ;;  %v2573_v9 = vmov (!%p291_p9), 8   ;;  %v420_v28 = vlaneseq (!%p291_p9) }
   0xf   : > { %440 = vperm.xlu1 (!%p291_p9), %2451, %v2706_v0   ;;  %341 = vst.msk [vmem:[#allocation2 + $0x28] sm:$0xff] (!%p291_p9), %vm337_vm0, %v2570_v3  ;;  %700 = vst [vmem:[#allocation2 + $0x18] sm:$0xff] (!%p291_p9), %v2570_v3  ;;  %680 = vmatprep.mubr.f32.mxu0 (!%p291_p9), %v2570_v3  ;;  %v2574_v10 = vmov (!%p291_p9), 3   ;;  %v2575_v11 = vmov (!%p291_p9), 1   ;;  %v2576_v12 = vmov (!%p291_p9), 6   ;;  %v2577_v13 = vmov (!%p291_p9), 2  }
  0x10   : > { %1250 = vmatprep.mubr.f32.mxu1 (!%p291_p9), %v2570_v3  ;;  %702 = vst.msk [vmem:[#allocation2 + $0x28] sm:$0xff] (!%p291_p9), %vm337_vm0, %v2570_v3  ;;  %v2578_v14 = vmov (!%p291_p9), 0   ;;  %vm353_vm1 = vcmask (!%p291_p9), 1047688   ;;  %vm348_vm2 = vcmask (!%p291_p9), 138240   ;;  %s2579_s29 = smov (!%p291_p9), 112   ;;  %s2580_s14 = smov (!%p291_p9), 96  }
  0x11   : > { %v421_v32 = vshrl.u32 (!%p291_p9), %v420_v28, 7  ;;  %v2186_v36 = vld [vmem:[%s3523_s2 + $0x1] ss:$8 sm:$0x3] (!%p291_p9)  ;;  %s2581_s21 = smov (!%p291_p9), 2   ;;  %vm389_vm3 = vcmask (!%p291_p9), 916480  }
  0x12   : > { %s3533_s22 = smov (!%p291_p9), 127   ;;  %vm412_vm4 = vcmask (!%p291_p9), 785408   ;;  %vm571_vm5 = vcmask (!%p291_p9), 15360   ;;  %vm496_vm6 = vcmask (!%p291_p9), 1039360   ;;  %vm588_vm7 = vcmask (!%p291_p9), 1031168   ;;  %s3538_s17 = smov (!%p291_p9), 126  }
  0x13   : > { %2452 = vset.pattern.permute.xlu1 (!%p291_p9), %v2571_v4  ;;  %v2769_v35 = vsub.s32 (!%p291_p9), 1, %v421_v32  ;;  %v2780_v40 = vsub.s32 (!%p291_p9), 0, %v421_v32  ;;  %vm609_vm8 = vcmask (!%p291_p9), 64512   ;;  %vm1179_vm9 = vcmask (!%p291_p9), 130048  }
  0x14   : > { %511 = vperm.xlu1 (!%p291_p9), %2452, %v2706_v0   ;;  %vm2100_vm10 = vcmask (!%p291_p9), 523264  }
  0x15   : > { %s327_s23 = scalar_select %p326_p10, %s2676_s13, 1  ;;  %v566_v39 = vrot.slane %v2186_v36, %v2769_v35  ;;  %v562_v43 = vrot.slane %v2186_v36, %v2780_v40 }
  0x17   : > { %s2204_s24 = sshll.u32 %s327_s23, 4  ;;  %s3531_s23 = smov 126  }
  0x18   : > { %s2724_s27 = scalar_lea.vmem %s3521_s0, %s2204_s24  ;;  %2454 = vset.pattern.permute.xlu1 %v2573_v9  ;;  %s323_s24 = sand.u32 1, %s2558_s10  }
  0x19   : > { %v331_v5 = vld [vmem:[%s2724_s27] sm:$0xff]  ;;  %v332_v6 = vld [vmem:[%s2724_s27 + $0x8] sm:$0xff]  ;;  %535 = vperm.xlu1 %2454, %v2706_v0   ;;  %s2183_s25 = sshll.u32 %s323_s24, 4 }
  0x1a   : > { %v333_v7 = vmax.f32 %v331_v5, 0.0  ;;  %v334_v8 = vmax.f32 %v332_v6, 0.0  ;;  %s325_s26 = scalar_lea.vmem [#allocation3], %s2183_s25 }
  0x1b   : > { %s2117_s16 = sshll.u32 %s325_s26, 4  ;;  %s3478_s16 = int_to_ptr.vmem [resolvable:$true] %s2117_s16 }
  0x1c   : > { %344 = vrot.lane.b32.xlu0 %v333_v7, %s2572_s28 }
  0x1d   : > { %2455 = vset.pattern.permute.xlu1 %v2574_v10 }
  0x1e   : > { %374 = vperm.xlu1 %2455, %v2706_v0  }
  0x20   : > { %346 = vrot.lane.b32.xlu0 %v334_v8, %s2572_s28 }
  0x22   : > { %2457 = vset.pattern.permute.xlu1 %v2575_v11 }
  0x23   : > { %433 = vperm.xlu1 %2457, %v2706_v0  }
  0x24   : > { %464 = vperm.xlu0 %2453, %v2706_v0  }
  0x27   : > { %2458 = vset.pattern.permute.xlu1 %v2577_v13 }
  0x28   : > { %2456 = vset.pattern.permute.xlu0 %v2576_v12  ;;  %504 = vperm.xlu1 %2458, %v2706_v0  }
  0x29   : > { %397 = vperm.xlu0 %2456, %v2706_v0  }
  0x2c   : > { %2460 = vset.pattern.permute.xlu1 %v2578_v14 }
  0x2d   : > { %2459 = vset.pattern.permute.xlu0 %v2578_v14 }
  0x8e   : > { %v345_v15 = vpop.permute.xlu0 %344  ;;  %v441_v17 = vpop.permute.xlu1 %440 }
  0x8f   : > { %354 = vst.msk [vmem:[#allocation2] sm:$0xff] %vm353_vm1, %v345_v15 }
  0x92   : > { %v347_v16 = vpop.permute.xlu0 %346 }
  0x93   : > { %356 = vst.msk [vmem:[#allocation2 + $0x10] sm:$0xff] %vm348_vm2, %v347_v16  ;;  %v512_v22 = vpop.permute.xlu1 %511  ;;  %v2758_v27 = vsel %vm348_vm2, %v345_v15, %v347_v16 }
  0x94   : > { %v444_v31 = vmul.f32 %v441_v17, %v2758_v27  ;;  %v515_v34 = vmul.f32 %v512_v22, %v2758_v27 }
  0x96   : > { %v2742_v18 = vld [vmem:[#allocation2] sm:$0xff] }
  0x97   : > { %v443_v19 = vmul.f32 %v441_v17, %v2742_v18  ;;  %697 = vst [vmem:[#allocation2] sm:$0xff] %v2570_v3  ;;  %v514_v25 = vmul.f32 %v512_v22, %v2742_v18 }
  0x98   : > { %v536_v30 = vpop.permute.xlu1 %535 }
  0x99   : > { %449 = vrot.lane.b32.xlu0 %v443_v19, %s2579_s29  ;;  %v538_v37 = vmul.f32 %v536_v30, %v2742_v18  ;;  %v539_v42 = vmul.f32 %v536_v30, %v2758_v27 }
  0x9a   : > { %v2747_v20 = vld [vmem:[#allocation2 + $0x10] sm:$0xff] }
  0x9b   : > { %v445_v21 = vmul.f32 %v441_v17, %v2747_v20  ;;  %699 = vst.msk [vmem:[#allocation2 + $0x10] sm:$0xff] %vm337_vm0, %v2570_v3  ;;  %v516_v23 = vmul.f32 %v512_v22, %v2747_v20  ;;  %v540_v33 = vmul.f32 %v536_v30, %v2747_v20 }
  0x9d   : > { %453 = vrot.lane.b32.xlu1 %v445_v21, %s2579_s29  ;;  %v375_v41 = vpop.permute.xlu1 %374 }
  0x9e   : > { %v379_v44 = vmul.f32 %v375_v41, %v2747_v20  ;;  %v378_v47 = vmul.f32 %v375_v41, %v2758_v27  ;;  %v377_v48 = vmul.f32 %v375_v41, %v2742_v18  ;;  %v2823_v41 = vld [vmem:[%s3525_s4] sm:$0xff] }
  0xa1   : > { %524 = vrot.lane.b32.xlu1 %v516_v23, %s2579_s29 }
  0xa2   : > { %v434_v51 = vpop.permute.xlu1 %433 }
  0xa3   : > { %v465_v24 = vpop.permute.xlu0 %464  ;;  %v438_v57 = vmul.f32 %v434_v51, %v2747_v20  ;;  %v437_v4 = vmul.f32 %v434_v51, %v2758_v27  ;;  %v436_v12 = vmul.f32 %v434_v51, %v2742_v18 }
  0xa4   : > { %v467_v26 = vmul.f32 %v465_v24, %v2742_v18  ;;  %v469_v29 = vmul.f32 %v465_v24, %v2747_v20  ;;  %v468_v38 = vmul.f32 %v465_v24, %v2758_v27 }
  0xa5   : > { %520 = vrot.lane.b32.xlu1 %v514_v25, %s2579_s29 }
  0xa6   : > { %473 = vrot.lane.b32.xlu0 %v467_v26, %s2580_s14 }
  0xa7   : > { %v505_v52 = vpop.permute.xlu1 %504 }
  0xa8   : > { %v398_v45 = vpop.permute.xlu0 %397  ;;  %v508_v17 = vmul.f32 %v505_v52, %v2758_v27  ;;  %v509_v19 = vmul.f32 %v505_v52, %v2747_v20  ;;  %v507_v25 = vmul.f32 %v505_v52, %v2742_v18 }
  0xa9   : > { %477 = vrot.lane.b32.xlu1 %v469_v29, %s2580_s14  ;;  %v400_v46 = vmul.f32 %v398_v45, %v2742_v18  ;;  %v401_v49 = vmul.f32 %v398_v45, %v2758_v27  ;;  %v402_v50 = vmul.f32 %v398_v45, %v2747_v20  ;;  %v2837_v45 = vld [vmem:[%s3524_s3 + $0x8] sm:$0xff] }
  0xaa   : > { %451 = vrot.lane.b32.xlu0 %v444_v31, %s2579_s29 }
  0xad   : > { %548 = vrot.lane.b32.xlu1 %v540_v33, %s2580_s14 }
  0xae   : > { %522 = vrot.lane.b32.xlu0 %v515_v34, %s2579_s29 }
  0xb1   : > { %544 = vrot.lane.b32.xlu1 %v538_v37, %s2580_s14 }
  0xb2   : > { %475 = vrot.lane.b32.xlu0 %v468_v38, %s2580_s14 }
  0xb5   : > { %569 = vrot.lane.b32.xlu1 %v566_v39, %s2581_s21 }
  0xb6   : > { %546 = vrot.lane.b32.xlu0 %v539_v42, %s2580_s14 }
  0xb9   : > { %387 = vrot.lane.b32.xlu1 %v379_v44, %s2579_s29  ;;  %v2584_v44 = vmov 13  }
  0xba   : > { %567 = vrot.lane.b32.xlu0 %v562_v43, %s2581_s21  ;;  %v2830_v43 = vld [vmem:[%s3525_s4 + $0x8] sm:$0xff] }
  0xbd   : > { %406 = vrot.lane.b32.xlu1 %v400_v46, %s2580_s14  ;;  %v2585_v46 = vmov 14  }
  0xbe   : > { %365 = vperm.xlu0 %2459, %v2706_v0  }
  0xc1   : > { %385 = vrot.lane.b32.xlu1 %v378_v47, %s2579_s29  ;;  %v2586_v47 = vmov 16  }
  0xc2   : > { %383 = vrot.lane.b32.xlu0 %v377_v48, %s2579_s29 }
  0xc5   : > { %408 = vrot.lane.b32.xlu1 %v401_v49, %s2580_s14 }
  0xc6   : > { %410 = vrot.lane.b32.xlu0 %v402_v50, %s2580_s14 }
 0x10b   : > { %v450_v55 = vpop.permute.xlu0 %449 }
 0x10f   : > { %v454_v53 = vpop.permute.xlu1 %453 }
 0x110   : > { %v462_v59 = vadd.f32 %v454_v53, %v438_v57 }
 0x113   : > { %v525_v54 = vpop.permute.xlu1 %524 }
 0x114   : > { %v533_v26 = vadd.f32 %v525_v54, %v509_v19 }
 0x117   : > { %v521_v56 = vpop.permute.xlu1 %520 }
 0x118   : > { %v474_v58 = vpop.permute.xlu0 %473 }
 0x11b   : > { %v478_v60 = vpop.permute.xlu1 %477 }
 0x11c   : > { %v486_v61 = vadd.f32 %v478_v60, %v462_v59  ;;  %v452_v62 = vpop.permute.xlu0 %451 }
 0x11d   : > { %v456_v2 = vsel %vm389_vm3, %v452_v62, %v454_v53  ;;  %v455_v7 = vsel %vm389_vm3, %v450_v55, %v452_v62  ;;  %v357_v62 = vld [vmem:[%s3523_s2] ss:$8 sm:$0x3] }
 0x11e   : > { %494 = vrot.lane.b32.xlu1 %v486_v61, %s3533_s22  ;;  %v461_v5 = vadd.f32 %v456_v2, %v437_v4  ;;  %v460_v21 = vadd.f32 %v455_v7, %v436_v12 }
 0x11f   : > { %v549_v63 = vpop.permute.xlu1 %548 }
 0x120   : > { %v523_v1 = vpop.permute.xlu0 %522  ;;  %v557_v32 = vadd.f32 %v549_v63, %v533_v26  ;;  %v596_v26 = vld [vmem:[%s3526_s5 + $0x8] sm:$0xff] }
 0x121   : > { %v527_v15 = vsel %vm389_vm3, %v523_v1, %v525_v54  ;;  %v526_v23 = vsel %vm389_vm3, %v521_v56, %v523_v1 }
 0x122   : > { %v532_v28 = vadd.f32 %v527_v15, %v508_v17  ;;  %v531_v33 = vadd.f32 %v526_v23, %v507_v25  ;;  %v595_v25 = vld [vmem:[%s3526_s5] sm:$0xff] }
 0x123   : > { %v545_v8 = vpop.permute.xlu1 %544 }
 0x124   : > { %v476_v6 = vpop.permute.xlu0 %475 }
 0x125   : > { %v480_v9 = vsel %vm412_vm4, %v476_v6, %v478_v60  ;;  %v479_v16 = vsel %vm412_vm4, %v474_v58, %v476_v6 }
 0x126   : > { %v485_v14 = vadd.f32 %v480_v9, %v461_v5  ;;  %v484_v29 = vadd.f32 %v479_v16, %v460_v21 }
 0x127   : > { %v570_v30 = vpop.permute.xlu1 %569 }
 0x128   : > { %492 = vrot.lane.b32.xlu0 %v485_v14, %s3533_s22  ;;  %v547_v22 = vpop.permute.xlu0 %546  ;;  %v578_v37 = vmul.f32 %v570_v30, %v557_v32 }
 0x129   : > { %v551_v24 = vsel %vm412_vm4, %v547_v22, %v549_v63  ;;  %v550_v31 = vsel %vm412_vm4, %v545_v8, %v547_v22 }
 0x12a   : > { %v556_v20 = vadd.f32 %v551_v24, %v532_v28  ;;  %v555_v38 = vadd.f32 %v550_v31, %v531_v33  ;;  %v2587_v28 = vmov 17  }
 0x12b   : > { %v388_v48 = vpop.permute.xlu1 %387 }
 0x12c   : > { %490 = vrot.lane.b32.xlu0 %v484_v29, %s3533_s22  ;;  %v568_v34 = vpop.permute.xlu0 %567 }
 0x12d   : > { %v572_v36 = vsel %vm571_vm5, %v568_v34, %v570_v30  ;;  %v576_v42 = vmul.f32 %v568_v34, %v555_v38 }
 0x12e   : > { %v577_v39 = vmul.f32 %v572_v36, %v556_v20 }
 0x12f   : > { %v407_v50 = vpop.permute.xlu1 %406 }
 0x130   : > { %586 = vrot.lane.b32.xlu0 %v578_v37, %s3531_s23  ;;  %584 = vrot.lane.b32.xlu1 %v577_v39, %s3531_s23 }
 0x133   : > { %v386_v52 = vpop.permute.xlu1 %385 }
 0x134   : > { %601 = vperm.xlu0 %2459, %v2823_v41   ;;  %582 = vrot.lane.b32.xlu1 %v576_v42, %s3531_s23  ;;  %v391_v56 = vsel %vm389_vm3, %v386_v52, %v388_v48  ;;  %v2589_v48 = vmov 15  }
 0x137   : > { %v409_v55 = vpop.permute.xlu1 %408 }
 0x138   : > { %606 = vperm.xlu1 %2460, %v2830_v43   ;;  %2461 = vset.pattern.permute.xlu0 %v2584_v44  ;;  %v413_v5 = vsel %vm412_vm4, %v407_v50, %v409_v55  ;;  %v2591_v50 = vmov 11  }
 0x139   : > { %877 = vperm.xlu0 %2461, %v2706_v0  }
 0x13c   : > { %2462 = vset.pattern.permute.xlu1 %v2584_v44 }
 0x13d   : > { %881 = vperm.xlu1 %2462, %v2837_v45   ;;  %2464 = vset.pattern.permute.xlu0 %v2585_v46  ;;  %v366_v49 = vpop.permute.xlu0 %365 }
 0x13e   : > { %1021 = vperm.xlu0 %2464, %v2837_v45   ;;  %v369_v53 = vmul.f32 %v366_v49, %v2758_v27  ;;  %v368_v59 = vmul.f32 %v2742_v18, %v366_v49  ;;  %v427_v27 = vrot.slane %v357_v62, %v2769_v35  ;;  %v423_v18 = vrot.slane %v357_v62, %v2780_v40 }
 0x13f   : > { %v2590_v49 = vmov 10  }
 0x140   : > { %v395_v60 = vadd.f32 %v391_v56, %v369_v53 }
 0x141   : > { %2463 = vset.pattern.permute.xlu1 %v2585_v46  ;;  %v384_v51 = vpop.permute.xlu0 %383 }
 0x142   : > { %1017 = vperm.xlu1 %2463, %v2706_v0   ;;  %v390_v57 = vsel %vm389_vm3, %v384_v51, %v386_v52  ;;  %2466 = vset.pattern.permute.xlu0 %v2587_v28  ;;  %v2592_v51 = vmov 9  }
 0x143   : > { %v394_v63 = vadd.f32 %v390_v57, %v368_v59 }
 0x145   : > { %v411_v54 = vpop.permute.xlu0 %410  ;;  %v417_v7 = vadd.f32 %v413_v5, %v394_v63 }
 0x146   : > { %2465 = vset.pattern.permute.xlu1 %v2586_v47  ;;  %v414_v58 = vsel %vm412_vm4, %v409_v55, %v411_v54  ;;  %v2588_v47 = vmov 12  }
 0x147   : > { %925 = vperm.xlu1 %2465, %v2706_v0   ;;  %v418_v1 = vadd.f32 %v414_v58, %v395_v60  ;;  %v430_v17 = vmul.f32 %v423_v18, %v417_v7 }
 0x149   : > { %v431_v8 = vmul.f32 %v427_v27, %v418_v1 }
 0x14b   : > { %929 = vperm.xlu1 %2465, %v2837_v45  }
 0x14f   : > { %2467 = vset.pattern.permute.xlu1 %v2587_v28 }
 0x190   : > { %v495_v2 = vpop.permute.xlu1 %494 }
 0x19a   : > { %v493_v61 = vpop.permute.xlu0 %492 }
 0x19b   : > { %v498_v6 = vsel %vm496_vm6, %v493_v61, %v495_v2 }
 0x19c   : > { %v502_v14 = vadd.f32 %v498_v6, %v431_v8 }
 0x19e   : > { %v491_v4 = vpop.permute.xlu0 %490 }
 0x19f   : > { %v497_v15 = vsel %vm496_vm6, %v491_v4, %v493_v61 }
 0x1a0   : > { %v501_v21 = vadd.f32 %v497_v15, %v430_v17 }
 0x1a2   : > { %v585_v9 = vpop.permute.xlu1 %584  ;;  %v587_v12 = vpop.permute.xlu0 %586 }
 0x1a3   : > { %v590_v16 = vsel %vm588_vm7, %v585_v9, %v587_v12 }
 0x1a4   : > { %v594_v19 = vadd.f32 %v590_v16, %v502_v14 }
 0x1a6   : > { %v583_v22 = vpop.permute.xlu1 %582  ;;  %616 = vmatprep.subr.mxu0 %v594_v19 }
 0x1a7   : > { %v589_v23 = vsel %vm588_vm7, %v583_v22, %v585_v9 }
 0x1a8   : > { %v593_v24 = vadd.f32 %v589_v23, %v501_v21 }
 0x1aa   : > { %617 = vmatpush1.msra.mxu0 %v593_v24 }
 0x1ab   : > { %2187 = vmatmul.mubr.msk.f32.vlgmr.msra.gmra.mrb[0].mxu0 %vm609_vm8, %v595_v25 }
 0x1ac   : > { %686 = vmatprep.mubr.f32.mxu0 %v2570_v3 }
 0x1af   : > { %2188 = vmatmul.mubr.msk.f32.gmra.mrb[2].mxu0 %vm609_vm8, %v596_v26 }
 0x1b3   : > { %v602_v29 = vpop.permute.xlu0 %601 }
 0x1b7   : > { %v607_v20 = vpop.permute.xlu1 %606 }
 0x1b8   : > { %v878_v54 = vpop.permute.xlu0 %877 }
 0x1bc   : > { %v882_v52 = vpop.permute.xlu1 %881 }
 0x1bd   : > { %v1022_v56 = vpop.permute.xlu0 %1021 }
 0x1c1   : > { %v1018_v53 = vpop.permute.xlu1 %1017 }
 0x1c6   : > { %v926_v55 = vpop.permute.xlu1 %925 }
 0x1ca   : > { %v2882_v57 = vpop.permute.xlu1 %929 }
 0x27e   : > { %v682_v30 = vpop.f32.mrb[0].mxu0 }
 0x27f   : > { %v683_v31 = vadd.f32 %v682_v30, %v602_v29  ;;  %v684_v32 = vpop.f32.mrb[1].mxu0 }
 0x280   : > { %v685_v33 = vadd.f32 %v684_v32, %v602_v29 }
 0x281   : > { %v693_v34 = vmax.f32 %v683_v31, 0.0 }
 0x282   : > { %v694_v36 = vmax.f32 %v685_v33, 0.0  ;;  %v688_v37 = vpop.f32.mrb[2].mxu0  ;;  %v2190_v33 = vld [vmem:[%s3523_s2 + $0x3] ss:$8 sm:$0x3] }
 0x283   : > { %v689_v38 = vadd.f32 %v688_v37, %v607_v20  ;;  %v690_v39 = vpop.f32.mrb[3].mxu0  ;;  %707 = vrot.lane.b32.xlu0 %v693_v34, %s2572_s28  ;;  %v1116_v34 = vrot.slane %v2190_v33, %v2780_v40 }
 0x284   : > { %709 = vrot.lane.b32.xlu1 %v694_v36, %s2572_s28  ;;  %v691_v44 = vadd.f32 %v690_v39, %v607_v20  ;;  %v1120_v39 = vrot.slane %v2190_v33, %v2769_v35 }
 0x285   : > { %v695_v42 = vmax.f32 %v689_v38, 0.0 }
 0x286   : > { %v696_v46 = vmax.f32 %v691_v44, 0.0 }
 0x287   : > { %711 = vrot.lane.b32.xlu0 %v695_v42, %s2572_s28 }
 0x288   : > { %1069 = vperm.xlu1 %2467, %v2837_v45  }
 0x28b   : > { %1065 = vperm.xlu0 %2466, %v2706_v0  }
 0x28c   : > { %713 = vrot.lane.b32.xlu1 %v696_v46, %s2572_s28 }
 0x28d   : > { %2468 = vset.pattern.permute.xlu1 %v2588_v47 }
 0x28f   : > { %2469 = vset.pattern.permute.xlu0 %v2588_v47 }
 0x290   : > { %760 = vperm.xlu1 %2468, %v2706_v0   ;;  %764 = vperm.xlu0 %2469, %v2837_v45  }
 0x294   : > { %2470 = vset.pattern.permute.xlu1 %v2589_v48  ;;  %2471 = vset.pattern.permute.xlu0 %v2590_v49 }
 0x295   : > { %804 = vperm.xlu1 %2470, %v2706_v0   ;;  %863 = vperm.xlu0 %2471, %v2706_v0  }
 0x299   : > { %808 = vperm.xlu1 %2470, %v2837_v45   ;;  %2474 = vset.pattern.permute.xlu0 %v2591_v50 }
 0x29a   : > { %1007 = vperm.xlu0 %2474, %v2837_v45  }
 0x29d   : > { %2472 = vset.pattern.permute.xlu1 %v2590_v49 }
 0x29e   : > { %867 = vperm.xlu1 %2472, %v2837_v45   ;;  %2475 = vset.pattern.permute.xlu0 %v2592_v51 }
 0x2a2   : > { %2473 = vset.pattern.permute.xlu1 %v2591_v50 }
 0x2a3   : > { %1003 = vperm.xlu1 %2473, %v2706_v0  }
 0x2a7   : > { %2476 = vset.pattern.permute.xlu1 %v2592_v51 }
 0x2f5   : > { %v708_v58 = vpop.permute.xlu0 %707 }
 0x2f6   : > { %723 = vst.msk [vmem:[#allocation2] sm:$0xff] %vm353_vm1, %v708_v58  ;;  %v710_v59 = vpop.permute.xlu1 %709 }
 0x2f7   : > { %725 = vst.msk [vmem:[#allocation2 + $0x10] sm:$0xff] %vm348_vm2, %v710_v59  ;;  %v2912_v14 = vsel %vm348_vm2, %v708_v58, %v710_v59 }
 0x2f8   : > { %v885_v15 = vmul.f32 %v878_v54, %v2912_v14  ;;  %v1025_v16 = vmul.f32 %v1018_v53, %v2912_v14  ;;  %v933_v21 = vmul.f32 %v926_v55, %v2912_v14 }
 0x2f9   : > { %v712_v60 = vpop.permute.xlu0 %711 }
 0x2fa   : > { %726 = vst.msk [vmem:[#allocation2 + $0x18] sm:$0xff] %vm353_vm1, %v712_v60 }
 0x2fd   : > { %v2887_v61 = vld [vmem:[#allocation2] sm:$0xff] }
 0x2fe   : > { %v884_v62 = vmul.f32 %v878_v54, %v2887_v61  ;;  %v2890_v63 = vld [vmem:[#allocation2 + $0x10] sm:$0xff]  ;;  %1267 = vst [vmem:[#allocation2] sm:$0xff] %v2570_v3  ;;  %v1024_v2 = vmul.f32 %v1018_v53, %v2887_v61  ;;  %v932_v5 = vmul.f32 %v926_v55, %v2887_v61 }
 0x2ff   : > { %v886_v1 = vmul.f32 %v878_v54, %v2890_v63  ;;  %1269 = vst.msk [vmem:[#allocation2 + $0x10] sm:$0xff] %vm337_vm0, %v2570_v3  ;;  %v1026_v4 = vmul.f32 %v1018_v53, %v2890_v63  ;;  %v934_v7 = vmul.f32 %v926_v55, %v2890_v63 }
 0x300   : > { %896 = vrot.lane.b32.xlu0 %v884_v62, %s2579_s29 }
 0x301   : > { %900 = vrot.lane.b32.xlu1 %v886_v1, %s2579_s29  ;;  %v2898_v27 = vld [vmem:[#allocation2 + $0x18] sm:$0xff] }
 0x302   : > { %1270 = vst [vmem:[#allocation2 + $0x18] sm:$0xff] %v2570_v3  ;;  %v887_v17 = vmul.f32 %v882_v52, %v2898_v27  ;;  %v1027_v22 = vmul.f32 %v1022_v56, %v2898_v27  ;;  %v935_v25 = vmul.f32 %v2882_v57, %v2898_v27 }
 0x304   : > { %1036 = vrot.lane.b32.xlu0 %v1024_v2, %s2579_s29 }
 0x305   : > { %1040 = vrot.lane.b32.xlu1 %v1026_v4, %s2579_s29 }
 0x307   : > { %v1070_v6 = vpop.permute.xlu1 %1069 }
 0x308   : > { %944 = vrot.lane.b32.xlu0 %v932_v5, %s2580_s14  ;;  %v1075_v28 = vmul.f32 %v1070_v6, %v2898_v27 }
 0x309   : > { %948 = vrot.lane.b32.xlu1 %v934_v7, %s2580_s14 }
 0x30a   : > { %v1066_v18 = vpop.permute.xlu0 %1065 }
 0x30b   : > { %v714_v8 = vpop.permute.xlu1 %713  ;;  %v1074_v9 = vmul.f32 %v1066_v18, %v2890_v63  ;;  %v1072_v12 = vmul.f32 %v1066_v18, %v2887_v61  ;;  %v1073_v23 = vmul.f32 %v1066_v18, %v2912_v14 }
 0x30c   : > { %728 = vst.msk [vmem:[#allocation2 + $0x28] sm:$0xff] %vm348_vm2, %v714_v8  ;;  %v2932_v24 = vsel %vm348_vm2, %v712_v60, %v714_v8 }
 0x30d   : > { %1088 = vrot.lane.b32.xlu1 %v1074_v9, %s2580_s14  ;;  %1084 = vrot.lane.b32.xlu0 %v1072_v12, %s2580_s14  ;;  %v888_v26 = vmul.f32 %v882_v52, %v2932_v24  ;;  %v1028_v29 = vmul.f32 %v1022_v56, %v2932_v24  ;;  %v936_v31 = vmul.f32 %v2882_v57, %v2932_v24 }
 0x30e   : > { %v1076_v20 = vmul.f32 %v1070_v6, %v2932_v24 }
 0x30f   : > { %v761_v38 = vpop.permute.xlu1 %760  ;;  %v765_v44 = vpop.permute.xlu0 %764 }
 0x310   : > { %v769_v42 = vmul.f32 %v761_v38, %v2890_v63  ;;  %v768_v48 = vmul.f32 %v761_v38, %v2912_v14  ;;  %v767_v49 = vmul.f32 %v761_v38, %v2887_v61  ;;  %v771_v55 = vmul.f32 %v765_v44, %v2932_v24 }
 0x311   : > { %898 = vrot.lane.b32.xlu1 %v885_v15, %s2579_s29  ;;  %1038 = vrot.lane.b32.xlu0 %v1025_v16, %s2579_s29 }
 0x313   : > { %v2922_v19 = vld [vmem:[#allocation2 + $0x28] sm:$0xff] }
 0x314   : > { %1272 = vst.msk [vmem:[#allocation2 + $0x28] sm:$0xff] %vm337_vm0, %v2570_v3  ;;  %v889_v30 = vmul.f32 %v882_v52, %v2922_v19  ;;  %v1029_v32 = vmul.f32 %v1022_v56, %v2922_v19  ;;  %v937_v36 = vmul.f32 %v2882_v57, %v2922_v19  ;;  %v1077_v37 = vmul.f32 %v1070_v6, %v2922_v19  ;;  %v805_v47 = vpop.permute.xlu1 %804  ;;  %v864_v57 = vpop.permute.xlu0 %863 }
 0x315   : > { %902 = vrot.lane.b32.xlu1 %v887_v17, %s2579_s29  ;;  %946 = vrot.lane.b32.xlu0 %v933_v21, %s2580_s14  ;;  %v772_v46 = vmul.f32 %v765_v44, %v2922_v19  ;;  %v813_v50 = vmul.f32 %v805_v47, %v2890_v63  ;;  %v812_v52 = vmul.f32 %v805_v47, %v2912_v14 }
 0x316   : > { %v811_v54 = vmul.f32 %v805_v47, %v2887_v61  ;;  %v872_v5 = vmul.f32 %v864_v57, %v2890_v63  ;;  %v871_v21 = vmul.f32 %v864_v57, %v2912_v14 }
 0x318   : > { %v809_v51 = vpop.permute.xlu1 %808 }
 0x319   : > { %1042 = vrot.lane.b32.xlu1 %v1027_v22, %s2579_s29  ;;  %1086 = vrot.lane.b32.xlu0 %v1073_v23, %s2580_s14  ;;  %v816_v53 = vmul.f32 %v809_v51, %v2922_v19  ;;  %v815_v56 = vmul.f32 %v809_v51, %v2932_v24  ;;  %v2996_v59 = vpop.permute.xlu0 %1007 }
 0x31d   : > { %950 = vrot.lane.b32.xlu1 %v935_v25, %s2580_s14  ;;  %904 = vrot.lane.b32.xlu0 %v888_v26, %s2579_s29  ;;  %v2994_v58 = vpop.permute.xlu1 %867 }
 0x321   : > { %1090 = vrot.lane.b32.xlu1 %v1075_v28, %s2580_s14  ;;  %1044 = vrot.lane.b32.xlu0 %v1028_v29, %s2579_s29  ;;  %v870_v29 = vmul.f32 %v864_v57, %v2887_v61 }
 0x322   : > { %v2998_v60 = vpop.permute.xlu1 %1003 }
 0x325   : > { %906 = vrot.lane.b32.xlu1 %v889_v30, %s2579_s29  ;;  %952 = vrot.lane.b32.xlu0 %v936_v31, %s2580_s14 }
 0x329   : > { %1046 = vrot.lane.b32.xlu1 %v1029_v32, %s2579_s29  ;;  %1092 = vrot.lane.b32.xlu0 %v1076_v20, %s2580_s14 }
 0x32d   : > { %954 = vrot.lane.b32.xlu1 %v937_v36, %s2580_s14  ;;  %1121 = vrot.lane.b32.xlu0 %v1116_v34, %s2581_s21 }
 0x331   : > { %1094 = vrot.lane.b32.xlu1 %v1077_v37, %s2580_s14  ;;  %741 = vperm.xlu0 %2475, %v2706_v0   ;;  %v770_v0 = vmul.f32 %v765_v44, %v2898_v27 }
 0x335   : > { %1123 = vrot.lane.b32.xlu1 %v1120_v39, %s2581_s21  ;;  %783 = vrot.lane.b32.xlu0 %v769_v42, %s2579_s29 }
 0x336   : > { %2478 = vset.pattern.permute.xlu0 %v2575_v11 }
 0x339   : > { %746 = vperm.xlu1 %2476, %v2837_v45   ;;  %789 = vrot.lane.b32.xlu0 %v772_v46, %s2579_s29 }
 0x33d   : > { %781 = vrot.lane.b32.xlu1 %v768_v48, %s2579_s29  ;;  %785 = vrot.lane.b32.xlu0 %v770_v0, %s2579_s29  ;;  %v1012_v0 = vmul.f32 %v2998_v60, %v2890_v63 }
 0x33e   : > { %2477 = vset.pattern.permute.xlu1 %v2575_v11  ;;  %v814_v11 = vmul.f32 %v809_v51, %v2898_v27 }
 0x341   : > { %779 = vrot.lane.b32.xlu1 %v767_v49, %s2579_s29  ;;  %827 = vrot.lane.b32.xlu0 %v813_v50, %s2580_s14  ;;  %v1011_v50 = vmul.f32 %v2998_v60, %v2912_v14 }
 0x345   : > { %825 = vrot.lane.b32.xlu1 %v812_v52, %s2580_s14  ;;  %833 = vrot.lane.b32.xlu0 %v816_v53, %s2580_s14 }
 0x349   : > { %823 = vrot.lane.b32.xlu1 %v811_v54, %s2580_s14  ;;  %829 = vrot.lane.b32.xlu0 %v814_v11, %s2580_s14 }
 0x34d   : > { %787 = vrot.lane.b32.xlu1 %v771_v55, %s2579_s29 }
 0x351   : > { %831 = vrot.lane.b32.xlu1 %v815_v56, %s2580_s14 }
 0x372   : > { %v897_v62 = vpop.permute.xlu0 %896 }
 0x373   : > { %v901_v1 = vpop.permute.xlu1 %900 }
 0x374   : > { %v920_v6 = vadd.f32 %v901_v1, %v872_v5 }
 0x376   : > { %v3000_v2 = vpop.permute.xlu0 %1036 }
 0x377   : > { %v1041_v4 = vpop.permute.xlu1 %1040 }
 0x378   : > { %v1060_v52 = vadd.f32 %v1041_v4, %v1012_v0 }
 0x37a   : > { %v945_v7 = vpop.permute.xlu0 %944 }
 0x37b   : > { %v949_v18 = vpop.permute.xlu1 %948 }
 0x37c   : > { %v968_v8 = vadd.f32 %v949_v18, %v920_v6  ;;  %v874_v6 = vmul.f32 %v2994_v58, %v2932_v24 }
 0x37e   : > { %982 = vrot.lane.b32.xlu0 %v968_v8, %s3533_s22 }
 0x37f   : > { %v1089_v9 = vpop.permute.xlu1 %1088  ;;  %v3004_v12 = vpop.permute.xlu0 %1084 }
 0x380   : > { %v1108_v11 = vadd.f32 %v1089_v9, %v1060_v52 }
 0x383   : > { %v899_v15 = vpop.permute.xlu1 %898  ;;  %v1039_v16 = vpop.permute.xlu0 %1038 }
 0x384   : > { %v909_v17 = vsel %vm389_vm3, %v899_v15, %v901_v1  ;;  %v908_v26 = vsel %vm389_vm3, %v897_v62, %v899_v15  ;;  %v1049_v49 = vsel %vm389_vm3, %v1039_v16, %v1041_v4  ;;  %v875_v62 = vmul.f32 %v2994_v58, %v2922_v19 }
 0x385   : > { %v919_v23 = vadd.f32 %v909_v17, %v871_v21  ;;  %v918_v33 = vadd.f32 %v908_v26, %v870_v29  ;;  %v1059_v54 = vadd.f32 %v1049_v49, %v1011_v50  ;;  %v873_v21 = vmul.f32 %v2994_v58, %v2898_v27 }
 0x387   : > { %v903_v22 = vpop.permute.xlu1 %902  ;;  %v947_v25 = vpop.permute.xlu0 %946 }
 0x388   : > { %v957_v28 = vsel %vm412_vm4, %v947_v25, %v949_v18  ;;  %v956_v31 = vsel %vm412_vm4, %v945_v7, %v947_v25 }
 0x389   : > { %v967_v30 = vadd.f32 %v957_v28, %v919_v23  ;;  %v966_v34 = vadd.f32 %v956_v31, %v918_v33  ;;  %v1010_v33 = vmul.f32 %v2998_v60, %v2887_v61 }
 0x38b   : > { %v1043_v32 = vpop.permute.xlu1 %1042  ;;  %980 = vrot.lane.b32.xlu1 %v967_v30, %s3533_s22  ;;  %v1087_v20 = vpop.permute.xlu0 %1086  ;;  %v1048_v30 = vsel %vm389_vm3, %v3000_v2, %v1039_v16 }
 0x38c   : > { %v1097_v53 = vsel %vm412_vm4, %v1087_v20, %v1089_v9  ;;  %v1014_v9 = vmul.f32 %v2996_v59, %v2932_v24  ;;  %v1096_v2 = vsel %vm412_vm4, %v3004_v12, %v1087_v20  ;;  %v3060_v12 = vld [vmem:[%s3524_s3] sm:$0xff]  ;;  %v2593_v20 = vmov 23  }
 0x38d   : > { %v1107_v55 = vadd.f32 %v1097_v53, %v1059_v54 }
 0x38f   : > { %v951_v36 = vpop.permute.xlu1 %950  ;;  %978 = vrot.lane.b32.xlu1 %v966_v34, %s3533_s22  ;;  %v905_v37 = vpop.permute.xlu0 %904 }
 0x390   : > { %v910_v15 = vsel %vm389_vm3, %v903_v22, %v905_v37  ;;  %v1015_v22 = vmul.f32 %v2996_v59, %v2922_v19 }
 0x391   : > { %v921_v31 = vadd.f32 %v910_v15, %v873_v21 }
 0x393   : > { %v1091_v38 = vpop.permute.xlu1 %1090  ;;  %v1045_v39 = vpop.permute.xlu0 %1044 }
 0x394   : > { %v1050_v58 = vsel %vm389_vm3, %v1043_v32, %v1045_v39 }
 0x397   : > { %v907_v42 = vpop.permute.xlu1 %906  ;;  %v953_v44 = vpop.permute.xlu0 %952 }
 0x398   : > { %v911_v1 = vsel %vm389_vm3, %v905_v37, %v907_v42  ;;  %v923_v4 = vadd.f32 %v907_v42, %v875_v62  ;;  %v958_v26 = vsel %vm412_vm4, %v951_v36, %v953_v44  ;;  %v1013_v36 = vmul.f32 %v2996_v59, %v2898_v27 }
 0x399   : > { %v922_v17 = vadd.f32 %v911_v1, %v874_v6  ;;  %v969_v37 = vadd.f32 %v958_v26, %v921_v31  ;;  %v1058_v42 = vadd.f32 %v1048_v30, %v1010_v33 }
 0x39b   : > { %v1047_v46 = vpop.permute.xlu1 %1046  ;;  %v1093_v48 = vpop.permute.xlu0 %1092  ;;  %v1106_v60 = vadd.f32 %v1096_v2, %v1058_v42 }
 0x39c   : > { %v1051_v18 = vsel %vm389_vm3, %v1045_v39, %v1047_v46  ;;  %v1063_v16 = vadd.f32 %v1047_v46, %v1015_v22  ;;  %v1098_v19 = vsel %vm412_vm4, %v1091_v38, %v1093_v48  ;;  %v2594_v38 = vmov 22  }
 0x39d   : > { %v1062_v28 = vadd.f32 %v1051_v18, %v1014_v9  ;;  %v2595_v46 = vmov 25  }
 0x39f   : > { %v955_v47 = vpop.permute.xlu1 %954  ;;  %v1122_v56 = vpop.permute.xlu0 %1121 }
 0x3a0   : > { %v959_v8 = vsel %vm412_vm4, %v953_v44, %v955_v47  ;;  %v971_v23 = vadd.f32 %v955_v47, %v923_v4  ;;  %v1061_v47 = vadd.f32 %v1050_v58, %v1013_v36  ;;  %v1129_v49 = vmul.f32 %v1122_v56, %v1106_v60 }
 0x3a1   : > { %v970_v29 = vadd.f32 %v959_v8, %v922_v17 }
 0x3a2   : > { %v1109_v32 = vadd.f32 %v1098_v19, %v1061_v47 }
 0x3a3   : > { %v1095_v51 = vpop.permute.xlu1 %1094 }
 0x3a4   : > { %v1099_v25 = vsel %vm412_vm4, %v1093_v48, %v1095_v51  ;;  %v1111_v0 = vadd.f32 %v1095_v51, %v1063_v16  ;;  %v1132_v59 = vmul.f32 %v1122_v56, %v1109_v32 }
 0x3a5   : > { %v1110_v34 = vadd.f32 %v1099_v25, %v1062_v28 }
 0x3a7   : > { %v1124_v57 = vpop.permute.xlu1 %1123 }
 0x3a8   : > { %v1125_v63 = vsel %vm571_vm5, %v1122_v56, %v1124_v57  ;;  %v1131_v5 = vmul.f32 %v1124_v57, %v1108_v11  ;;  %v1134_v39 = vmul.f32 %v1124_v57, %v1111_v0 }
 0x3a9   : > { %v1130_v7 = vmul.f32 %v1125_v63, %v1107_v55  ;;  %v1133_v44 = vmul.f32 %v1125_v63, %v1110_v34 }
 0x3aa   : > { %1145 = vrot.lane.b32.xlu0 %v1131_v5, %s3531_s23 }
 0x3ab   : > { %1143 = vrot.lane.b32.xlu1 %v1130_v7, %s3531_s23 }
 0x3ae   : > { %988 = vrot.lane.b32.xlu0 %v971_v23, %s3533_s22  ;;  %v2189_v23 = vld [vmem:[%s3523_s2 + $0x2] ss:$8 sm:$0x3] }
 0x3af   : > { %986 = vrot.lane.b32.xlu1 %v970_v29, %s3533_s22  ;;  %v855_v33 = vrot.slane %v2189_v23, %v2769_v35  ;;  %v851_v47 = vrot.slane %v2189_v23, %v2780_v40 }
 0x3b0   : > { %v742_v50 = vpop.permute.xlu0 %741 }
 0x3b1   : > { %v750_v17 = vmul.f32 %v742_v50, %v2912_v14 }
 0x3b2   : > { %984 = vrot.lane.b32.xlu0 %v969_v37, %s3533_s22 }
 0x3b3   : > { %1149 = vrot.lane.b32.xlu1 %v1133_v44, %s3531_s23 }
 0x3b4   : > { %v784_v52 = vpop.permute.xlu0 %783 }
 0x3b6   : > { %1151 = vrot.lane.b32.xlu0 %v1134_v39, %s3531_s23 }
 0x3b7   : > { %1141 = vrot.lane.b32.xlu1 %v1129_v49, %s3531_s23 }
 0x3b8   : > { %v747_v48 = vpop.permute.xlu1 %746  ;;  %v790_v54 = vpop.permute.xlu0 %789 }
 0x3b9   : > { %v752_v21 = vmul.f32 %v747_v48, %v2932_v24  ;;  %v749_v24 = vmul.f32 %v2887_v61, %v742_v50  ;;  %v751_v58 = vmul.f32 %v2898_v27, %v747_v48 }
 0x3ba   : > { %1147 = vrot.lane.b32.xlu0 %v1132_v59, %s3531_s23  ;;  %s2205_s23 = sshll.u32 %s2676_s13, 8  ;;  %s2504_s13 = scalar_lea.vmem %s3478_s16, 256 }
 0x3bb   : > { %1171 = vperm.xlu1 %2477, %v2823_v41   ;;  %v2596_v41 = vmov 26   ;;  %p2505_p11 = scmp.ne.s32.totalorder %s3478_s16, %s2504_s13 }
 0x3bc   : > { %v782_v51 = vpop.permute.xlu1 %781  ;;  %v786_v55 = vpop.permute.xlu0 %785 }
 0x3bd   : > { %v792_v8 = vsel %vm389_vm3, %v782_v51, %v784_v52  ;;  %p2506_p12 = pnand %p2505_p11, %p2693_p5 }
 0x3be   : > { %1176 = vperm.xlu0 %2478, %v2830_v43   ;;  %v2597_v43 = vmov 21   ;;  %v800_v28 = vadd.f32 %v792_v8, %v750_v17  ;;  %v2598_v8 = vmov 24  }
 0x3bf   : > { %2480 = vset.pattern.permute.xlu1 %v2593_v20  ;;  %p2507_p13 = pneg %p2506_p12 }
 0x3c0   : > { %1587 = vperm.xlu1 %2480, %v3060_v12   ;;  %v780_v53 = vpop.permute.xlu1 %779  ;;  %v828_v57 = vpop.permute.xlu0 %827 }
 0x3c1   : > { %v791_v31 = vsel %vm389_vm3, %v780_v53, %v782_v51 }
 0x3c2   : > { %2479 = vset.pattern.permute.xlu0 %v2594_v38  ;;  %v799_v37 = vadd.f32 %v791_v31, %v749_v24  ;;  %v2600_v24 = vmov 20  }
 0x3c3   : > { %1447 = vperm.xlu0 %2479, %v3060_v12  }
 0x3c4   : > { %2481 = vset.pattern.permute.xlu1 %v2595_v46  ;;  %v826_v11 = vpop.permute.xlu1 %825  ;;  %v834_v1 = vpop.permute.xlu0 %833 }
 0x3c5   : > { %1495 = vperm.xlu1 %2481, %v3060_v12   ;;  %v836_v25 = vsel %vm412_vm4, %v826_v11, %v828_v57 }
 0x3c6   : > { %v844_v34 = vadd.f32 %v836_v25, %v800_v28 }
 0x3c7   : > { %2482 = vset.pattern.permute.xlu0 %v2596_v41 }
 0x3c8   : > { %1635 = vperm.xlu0 %2482, %v3060_v12   ;;  %v824_v56 = vpop.permute.xlu1 %823  ;;  %v830_v6 = vpop.permute.xlu0 %829  ;;  %v859_v27 = vmul.f32 %v855_v33, %v844_v34 }
 0x3c9   : > { %2483 = vset.pattern.permute.xlu1 %v2594_v38  ;;  %v835_v2 = vsel %vm412_vm4, %v824_v56, %v826_v11 }
 0x3ca   : > { %1451 = vperm.xlu1 %2483, %v2837_v45   ;;  %v843_v32 = vadd.f32 %v835_v2, %v799_v37 }
 0x3cc   : > { %2485 = vset.pattern.permute.xlu0 %v2595_v46  ;;  %v788_v62 = vpop.permute.xlu1 %787  ;;  %v858_v51 = vmul.f32 %v851_v47, %v843_v32 }
 0x3cd   : > { %1499 = vperm.xlu0 %2485, %v2837_v45   ;;  %v794_v9 = vsel %vm389_vm3, %v788_v62, %v790_v54  ;;  %v793_v22 = vsel %vm389_vm3, %v786_v55, %v788_v62 }
 0x3ce   : > { %2484 = vset.pattern.permute.xlu1 %v2593_v20  ;;  %v802_v29 = vadd.f32 %v794_v9, %v752_v21  ;;  %v801_v42 = vadd.f32 %v793_v22, %v751_v58  ;;  %v2599_v9 = vmov 19   ;;  %v2194_v58 = vld [vmem:[%s3523_s2 + $0x5] ss:$8 sm:$0x3] }
 0x3cf   : > { %1591 = vperm.xlu1 %2484, %v2837_v45   ;;  %v1686_v34 = vrot.slane %v2194_v58, %v2780_v40 }
 0x3d0   : > { %v832_v63 = vpop.permute.xlu1 %831 }
 0x3d1   : > { %v838_v26 = vsel %vm412_vm4, %v832_v63, %v834_v1  ;;  %v837_v16 = vsel %vm412_vm4, %v830_v6, %v832_v63  ;;  %2488 = vset.pattern.permute.xlu0 %v2598_v8 }
 0x3d2   : > { %v846_v36 = vadd.f32 %v838_v26, %v802_v29  ;;  %v845_v61 = vadd.f32 %v837_v16, %v801_v42 }
 0x3d3   : > { %2486 = vset.pattern.permute.xlu1 %v2596_v41 }
 0x3d4   : > { %1639 = vperm.xlu1 %2486, %v2837_v45   ;;  %v861_v39 = vmul.f32 %v855_v33, %v846_v36  ;;  %v860_v52 = vmul.f32 %v851_v47, %v845_v61  ;;  %v2601_v36 = vmov 18  }
 0x3d8   : > { %2487 = vset.pattern.permute.xlu1 %v2597_v43 }
 0x3d9   : > { %1330 = vperm.xlu1 %2487, %v3060_v12  }
 0x3dd   : > { %2489 = vset.pattern.permute.xlu1 %v2599_v9 }
 0x3f0   : > { %v983_v7 = vpop.permute.xlu0 %982 }
 0x3fd   : > { %v981_v5 = vpop.permute.xlu1 %980 }
 0x3fe   : > { %v991_v44 = vsel %vm496_vm6, %v981_v5, %v983_v7  ;;  %v1165_v7 = vld [vmem:[%s3527_s6] sm:$0xff] }
 0x3ff   : > { %v999_v38 = vadd.f32 %v991_v44, %v859_v27 }
 0x401   : > { %v979_v4 = vpop.permute.xlu1 %978 }
 0x402   : > { %v990_v46 = vsel %vm496_vm6, %v979_v4, %v981_v5  ;;  %v1166_v4 = vld [vmem:[%s3527_s6 + $0x8] sm:$0xff] }
 0x403   : > { %v998_v55 = vadd.f32 %v990_v46, %v858_v51 }
 0x41c   : > { %v1146_v18 = vpop.permute.xlu0 %1145 }
 0x41d   : > { %v1144_v15 = vpop.permute.xlu1 %1143 }
 0x41e   : > { %v1154_v49 = vsel %vm588_vm7, %v1144_v15, %v1146_v18  ;;  %v2501_v18 = vld [vmem:[%s2724_s27 + $0x8] sm:$0xff] }
 0x41f   : > { %v1162_v53 = vadd.f32 %v1154_v49, %v999_v38 }
 0x420   : > { %v989_v30 = vpop.permute.xlu0 %988 }
 0x421   : > { %v987_v14 = vpop.permute.xlu1 %986 }
 0x422   : > { %v993_v0 = vsel %vm496_vm6, %v987_v14, %v989_v30 }
 0x423   : > { %v1001_v59 = vadd.f32 %v993_v0, %v861_v39 }
 0x424   : > { %v985_v19 = vpop.permute.xlu0 %984 }
 0x425   : > { %v1150_v60 = vpop.permute.xlu1 %1149  ;;  %v992_v41 = vsel %vm496_vm6, %v985_v19, %v987_v14 }
 0x426   : > { %v1000_v56 = vadd.f32 %v992_v41, %v860_v52 }
 0x428   : > { %v1152_v20 = vpop.permute.xlu0 %1151 }
 0x429   : > { %v1156_v48 = vsel %vm588_vm7, %v1150_v60, %v1152_v20  ;;  %v1142_v50 = vpop.permute.xlu1 %1141 }
 0x42a   : > { %v1164_v54 = vadd.f32 %v1156_v48, %v1001_v59  ;;  %v1153_v11 = vsel %vm588_vm7, %v1142_v50, %v1144_v15 }
 0x42b   : > { %v1161_v63 = vadd.f32 %v1153_v11, %v998_v55 }
 0x42c   : > { %v1148_v57 = vpop.permute.xlu0 %1147  ;;  %v2298_v62 = vpack.c.bf16 %v1164_v54, %v1162_v53 }
 0x42d   : > { %v1155_v1 = vsel %vm588_vm7, %v1148_v57, %v1150_v60 }
 0x42e   : > { %v1163_v5 = vadd.f32 %v1155_v1, %v1000_v56  ;;  %2299 = vmatprep.subr.bf16.mxu1 %v2298_v62 }
 0x430   : > { %v2300_v6 = vpack.c.bf16 %v1163_v5, %v1161_v63 }
 0x432   : > { %2301 = vmatpush1.bf16.msra.mxu1 %v2300_v6 }
 0x435   : > { %2191 = vmatmul.mubr.msk.f32.vlgmr.msra.gmra.mrb[0].mxu1 %vm1179_vm9, %v1165_v7 }
 0x436   : > { %1256 = vmatprep.mubr.f32.mxu1 %v2570_v3 }
 0x439   : > { %2192 = vmatmul.mubr.msk.f32.gmra.mrb[2].mxu1 %vm1179_vm9, %v1166_v4 }
 0x43a   : > { %2001 = vmatprep.mubr.f32.mxu1 %v2501_v18  ;;  %v1172_v15 = vpop.permute.xlu1 %1171 }
 0x43d   : > { %v1177_v28 = vpop.permute.xlu0 %1176 }
 0x43f   : > { %v1588_v2 = vpop.permute.xlu1 %1587 }
 0x442   : > { %v1448_v19 = vpop.permute.xlu0 %1447 }
 0x444   : > { %v1496_v16 = vpop.permute.xlu1 %1495 }
 0x447   : > { %v1636_v47 = vpop.permute.xlu0 %1635 }
 0x449   : > { %v1452_v37 = vpop.permute.xlu1 %1451 }
 0x44c   : > { %v1500_v60 = vpop.permute.xlu0 %1499 }
 0x44e   : > { %v1592_v42 = vpop.permute.xlu1 %1591 }
 0x453   : > { %v3127_v44 = vpop.permute.xlu1 %1639 }
 0x458   : > { %v3129_v0 = vpop.permute.xlu1 %1330 }
 0x508   : > { %v1252_v17 = vpop.f32.mrb[0].mxu1 }
 0x509   : > { %v1253_v21 = vadd.f32 %v1252_v17, %v1172_v15  ;;  %v1254_v23 = vpop.f32.mrb[1].mxu1 }
 0x50a   : > { %v1255_v26 = vadd.f32 %v1254_v23, %v1172_v15 }
 0x50b   : > { %v1263_v25 = vmax.f32 %v1253_v21, 0.0 }
 0x50c   : > { %v1258_v3 = vpop.f32.mrb[2].mxu1  ;;  %v1264_v22 = vmax.f32 %v1255_v26, 0.0 }
 0x50d   : > { %v1260_v29 = vpop.f32.mrb[3].mxu1  ;;  %1277 = vrot.lane.b32.xlu1 %v1263_v25, %s2572_s28  ;;  %v1259_v30 = vadd.f32 %v1258_v3, %v1177_v28 }
 0x50e   : > { %v1261_v31 = vadd.f32 %v1260_v29, %v1177_v28 }
 0x50f   : > { %v1265_v14 = vmax.f32 %v1259_v30, 0.0 }
 0x510   : > { %v1266_v33 = vmax.f32 %v1261_v31, 0.0  ;;  %v2502_v31 = vld [vmem:[%s3524_s3 + $0x8] sm:$0xff] }
 0x511   : > { %1279 = vrot.lane.b32.xlu1 %v1264_v22, %s2572_s28 }
 0x512   : > { %1283 = vrot.lane.b32.xlu0 %v1266_v33, %s2572_s28 }
 0x515   : > { %1281 = vrot.lane.b32.xlu1 %v1265_v14, %s2572_s28 }
 0x516   : > { %1374 = vperm.xlu0 %2488, %v3060_v12  }
 0x519   : > { %1433 = vperm.xlu1 %2489, %v3060_v12  }
 0x51a   : > { %2491 = vset.pattern.permute.xlu0 %v2597_v43  ;;  %v1690_v43 = vrot.slane %v2194_v58, %v2769_v35 }
 0x51b   : > { %1334 = vperm.xlu0 %2491, %v2837_v45  }
 0x51d   : > { %2490 = vset.pattern.permute.xlu1 %v2600_v24 }
 0x51e   : > { %1573 = vperm.xlu1 %2490, %v3060_v12  }
 0x51f   : > { %2494 = vset.pattern.permute.xlu0 %v2600_v24 }
 0x520   : > { %1577 = vperm.xlu0 %2494, %v2837_v45  }
 0x522   : > { %2492 = vset.pattern.permute.xlu1 %v2598_v8 }
 0x523   : > { %1378 = vperm.xlu1 %2492, %v2837_v45  }
 0x524   : > { %1691 = vrot.lane.b32.xlu0 %v1686_v34, %s2581_s21 }
 0x525   : > { %2495 = vset.pattern.permute.xlu0 %v2601_v36 }
 0x527   : > { %2493 = vset.pattern.permute.xlu1 %v2599_v9 }
 0x528   : > { %1437 = vperm.xlu1 %2493, %v2837_v45  }
 0x52c   : > { %1693 = vrot.lane.b32.xlu1 %v1690_v43, %s2581_s21  ;;  %s3537_s21 = smov 127  }
 0x52d   : > { %2496 = vset.pattern.permute.xlu1 %v2601_v36 }
 0x57f   : > { %v1278_v32 = vpop.permute.xlu1 %1277 }
 0x580   : > { %1293 = vst.msk [vmem:[#allocation2] sm:$0xff] %vm353_vm1, %v1278_v32 }
 0x583   : > { %v1280_v45 = vpop.permute.xlu1 %1279 }
 0x584   : > { %v3133_v61 = vsel %vm348_vm2, %v1278_v32, %v1280_v45  ;;  %1295 = vst.msk [vmem:[#allocation2 + $0x10] sm:$0xff] %vm348_vm2, %v1280_v45  ;;  %v1284_v39 = vpop.permute.xlu0 %1283 }
 0x585   : > { %1298 = vst.msk [vmem:[#allocation2 + $0x28] sm:$0xff] %vm348_vm2, %v1284_v39  ;;  %v1595_v50 = vmul.f32 %v1588_v2, %v3133_v61  ;;  %v1503_v52 = vmul.f32 %v1496_v16, %v3133_v61  ;;  %v1643_v11 = vmul.f32 %v1636_v47, %v3133_v61  ;;  %v1455_v6 = vmul.f32 %v1448_v19, %v3133_v61 }
 0x586   : > { %v1338_v22 = vmul.f32 %v3129_v0, %v3133_v61 }
 0x587   : > { %v1282_v27 = vpop.permute.xlu1 %1281  ;;  %v3137_v49 = vld [vmem:[#allocation2] sm:$0xff] }
 0x588   : > { %v3140_v59 = vsel %vm348_vm2, %v1282_v27, %v1284_v39  ;;  %1296 = vst.msk [vmem:[#allocation2 + $0x18] sm:$0xff] %vm353_vm1, %v1282_v27  ;;  %v1594_v20 = vmul.f32 %v1588_v2, %v3137_v49  ;;  %v1454_v38 = vmul.f32 %v1448_v19, %v3137_v49  ;;  %v1502_v46 = vmul.f32 %v1496_v16, %v3137_v49  ;;  %v1737_v39 = vld [vmem:[%s3522_s1 + $0x10] sm:$0xff]  ;;  %v1738_v27 = vld [vmem:[%s3522_s1 + $0x18] sm:$0xff] }
 0x589   : > { %v1642_v41 = vmul.f32 %v1636_v47, %v3137_v49  ;;  %v1458_v7 = vmul.f32 %v1452_v37, %v3140_v59  ;;  %v1598_v18 = vmul.f32 %v1592_v42, %v3140_v59  ;;  %v1506_v15 = vmul.f32 %v1500_v60, %v3140_v59 }
 0x58a   : > { %1606 = vrot.lane.b32.xlu1 %v1594_v20, %s2579_s29  ;;  %1466 = vrot.lane.b32.xlu0 %v1454_v38, %s2579_s29  ;;  %v1646_v21 = vmul.f32 %v3127_v44, %v3140_v59  ;;  %v1337_v24 = vmul.f32 %v3129_v0, %v3137_v49  ;;  %v1755_v20 = vld [vmem:[%s3522_s1 + $0xa0] sm:$0xff]  ;;  %v1756_v38 = vld [vmem:[%s3522_s1 + $0xa8] sm:$0xff] }
 0x58b   : > { %v3149_v48 = vld [vmem:[#allocation2 + $0x10] sm:$0xff] }
 0x58c   : > { %v1456_v51 = vmul.f32 %v1448_v19, %v3149_v48  ;;  %v1596_v53 = vmul.f32 %v1588_v2, %v3149_v48  ;;  %v1504_v55 = vmul.f32 %v1496_v16, %v3149_v48  ;;  %v1644_v1 = vmul.f32 %v1636_v47, %v3149_v48  ;;  %v3189_v8 = vld [vmem:[#allocation2 + $0x28] sm:$0xff]  ;;  %v1735_v19 = vld [vmem:[%s3522_s1] sm:$0xff] }
 0x58d   : > { %v1459_v9 = vmul.f32 %v1452_v37, %v3189_v8  ;;  %v1599_v17 = vmul.f32 %v1592_v42, %v3189_v8  ;;  %v1507_v23 = vmul.f32 %v1500_v60, %v3189_v8  ;;  %v1647_v26 = vmul.f32 %v3127_v44, %v3189_v8  ;;  %v1736_v47 = vld [vmem:[%s3522_s1 + $0x8] sm:$0xff] }
 0x58e   : > { %1514 = vrot.lane.b32.xlu0 %v1502_v46, %s2580_s14  ;;  %1654 = vrot.lane.b32.xlu1 %v1642_v41, %s2580_s14  ;;  %v1339_v3 = vmul.f32 %v3129_v0, %v3149_v48  ;;  %v1753_v0 = vld [vmem:[%s3522_s1 + $0x90] sm:$0xff]  ;;  %v2304_v32 = vpack.c.bf16 %v1736_v47, %v1735_v19  ;;  %v2308_v46 = vpack.c.bf16 %v1738_v27, %v1737_v39  ;;  %v1747_v47 = vld [vmem:[%s3522_s1 + $0x60] sm:$0xff] }
 0x58f   : > { %v3169_v57 = vld [vmem:[#allocation2 + $0x18] sm:$0xff]  ;;  %v2310_v41 = vpack.c.bf16 %v1756_v38, %v1755_v20 }
 0x590   : > { %v1457_v62 = vmul.f32 %v1452_v37, %v3169_v57  ;;  %v1597_v4 = vmul.f32 %v1592_v42, %v3169_v57  ;;  %v1505_v25 = vmul.f32 %v1500_v60, %v3169_v57  ;;  %v1645_v28 = vmul.f32 %v3127_v44, %v3169_v57  ;;  %v1751_v37 = vld [vmem:[%s3522_s1 + $0x80] sm:$0xff]  ;;  %v1752_v42 = vld [vmem:[%s3522_s1 + $0x88] sm:$0xff]  ;;  %v1754_v60 = vld [vmem:[%s3522_s1 + $0x98] sm:$0xff] }
 0x591   : > { %v2302_v44 = vpack.c.bf16 %v1752_v42, %v1751_v37  ;;  %v2306_v45 = vpack.c.bf16 %v1754_v60, %v1753_v0  ;;  %v1763_v37 = vld [vmem:[%s3522_s1 + $0xe0] sm:$0xff]  ;;  %v1748_v0 = vld [vmem:[%s3522_s1 + $0x68] sm:$0xff] }
 0x592   : > { %1608 = vrot.lane.b32.xlu0 %v1595_v50, %s2579_s29  ;;  %1470 = vrot.lane.b32.xlu1 %v1456_v51, %s2579_s29  ;;  %v1740_v50 = vld [vmem:[%s3522_s1 + $0x28] sm:$0xff]  ;;  %v2328_v60 = vpack.c.bf16 %v1748_v0, %v1747_v47 }
 0x593   : > { %2303 = vmatprep.subr.bf16.mxu0 %v2302_v44  ;;  %2339 = vmatprep.subr.bf16.mxu1 %v2302_v44 }
 0x594   : > { %2305 = vmatpush3.bf16.msra.mxu0 %v2304_v32  ;;  %2341 = vmatpush3.bf16.msra.mxu1 %v2304_v32  ;;  %v1765_v32 = vld [vmem:[%s3522_s1 + $0xf0] sm:$0xff] }
 0x595   : > { %v1375_v29 = vpop.permute.xlu0 %1374  ;;  %2307 = vmatprep.subr.bf16.mxu0 %v2306_v45  ;;  %2343 = vmatprep.subr.bf16.mxu1 %v2306_v45  ;;  %v1766_v45 = vld [vmem:[%s3522_s1 + $0xf8] sm:$0xff] }
 0x596   : > { %1516 = vrot.lane.b32.xlu0 %v1503_v52, %s2580_s14  ;;  %1610 = vrot.lane.b32.xlu1 %v1596_v53, %s2579_s29  ;;  %v1382_v30 = vmul.f32 %v1375_v29, %v3133_v61  ;;  %v1383_v34 = vmul.f32 %v1375_v29, %v3149_v48  ;;  %v2330_v27 = vpack.c.bf16 %v1766_v45, %v1765_v32 }
 0x598   : > { %v3161_v54 = vpop.permute.xlu1 %1433  ;;  %2309 = vmatpush3.bf16.msra.mxu0 %v2308_v46  ;;  %2345 = vmatpush3.bf16.msra.mxu1 %v2308_v46 }
 0x599   : > { %v3167_v56 = vmul.f32 %v3161_v54, %v3149_v48  ;;  %2311 = vmatprep.subr.bf16.mxu0 %v2310_v41  ;;  %2347 = vmatprep.subr.bf16.mxu1 %v2310_v41  ;;  %v1440_v20 = vmul.f32 %v3161_v54, %v3137_v49  ;;  %v1441_v38 = vmul.f32 %v3161_v54, %v3133_v61 }
 0x59a   : > { %1656 = vrot.lane.b32.xlu0 %v1643_v11, %s2580_s14  ;;  %1518 = vrot.lane.b32.xlu1 %v1504_v55, %s2580_s14  ;;  %v1335_v33 = vpop.permute.xlu0 %1334 }
 0x59b   : > { %v1342_v14 = vmul.f32 %v1335_v33, %v3189_v8  ;;  %v1341_v16 = vmul.f32 %v1335_v33, %v3140_v59 }
 0x59d   : > { %v3175_v63 = vpop.permute.xlu1 %1573 }
 0x59e   : > { %v3179_v5 = vmul.f32 %v3175_v63, %v3149_v48  ;;  %1472 = vrot.lane.b32.xlu0 %v1457_v62, %s2579_s29  ;;  %1658 = vrot.lane.b32.xlu1 %v1644_v1, %s2580_s14  ;;  %v1739_v48 = vld [vmem:[%s3522_s1 + $0x20] sm:$0xff]  ;;  %v1581_v46 = vmul.f32 %v3175_v63, %v3133_v61 }
 0x59f   : > { %v2312_v51 = vpack.c.bf16 %v1740_v50, %v1739_v48  ;;  %v3281_v52 = vpop.permute.xlu0 %1577  ;;  %v1749_v50 = vld [vmem:[%s3522_s1 + $0x70] sm:$0xff] }
 0x5a0   : > { %v1584_v45 = vmul.f32 %v3281_v52, %v3140_v59 }
 0x5a1   : > { %2313 = vmatpush3.bf16.msra.mxu0 %v2312_v51  ;;  %2349 = vmatpush3.bf16.msra.mxu1 %v2312_v51  ;;  %v1750_v51 = vld [vmem:[%s3522_s1 + $0x78] sm:$0xff] }
 0x5a2   : > { %1468 = vrot.lane.b32.xlu1 %v1455_v6, %s2579_s29  ;;  %1474 = vrot.lane.b32.xlu0 %v1458_v7, %s2579_s29  ;;  %v1379_v58 = vpop.permute.xlu1 %1378 }
 0x5a3   : > { %v1384_v43 = vmul.f32 %v1379_v58, %v3169_v57  ;;  %v1385_v36 = vmul.f32 %v1379_v58, %v3140_v59  ;;  %v1386_v2 = vmul.f32 %v1379_v58, %v3189_v8  ;;  %v3287_v55 = vpop.permute.xlu0 %1691 }
 0x5a6   : > { %1612 = vrot.lane.b32.xlu1 %v1597_v4, %s2579_s29  ;;  %1614 = vrot.lane.b32.xlu0 %v1598_v18, %s2579_s29  ;;  %v1757_v4 = vld [vmem:[%s3522_s1 + $0xb0] sm:$0xff]  ;;  %v1758_v18 = vld [vmem:[%s3522_s1 + $0xb8] sm:$0xff] }
 0x5a7   : > { %v3283_v53 = vpop.permute.xlu1 %1437 }
 0x5aa   : > { %1476 = vrot.lane.b32.xlu1 %v1459_v9, %s2579_s29  ;;  %1522 = vrot.lane.b32.xlu0 %v1506_v15, %s2580_s14  ;;  %v1741_v9 = vld [vmem:[%s3522_s1 + $0x30] sm:$0xff]  ;;  %v2314_v15 = vpack.c.bf16 %v1758_v18, %v1757_v4 }
 0x5ab   : > { %v3285_v11 = vpop.permute.xlu1 %1693 }
 0x5ac   : > { %2315 = vmatprep.subr.bf16.mxu0 %v2314_v15  ;;  %2351 = vmatprep.subr.bf16.mxu1 %v2314_v15 }
 0x5ae   : > { %1616 = vrot.lane.b32.xlu1 %v1599_v17, %s2579_s29  ;;  %1662 = vrot.lane.b32.xlu0 %v1646_v21, %s2580_s14  ;;  %v1742_v17 = vld [vmem:[%s3522_s1 + $0x38] sm:$0xff]  ;;  %v1759_v21 = vld [vmem:[%s3522_s1 + $0xc0] sm:$0xff] }
 0x5b2   : > { %1524 = vrot.lane.b32.xlu1 %v1507_v23, %s2580_s14  ;;  %1520 = vrot.lane.b32.xlu0 %v1505_v25, %s2580_s14  ;;  %v1760_v23 = vld [vmem:[%s3522_s1 + $0xc8] sm:$0xff]  ;;  %v2316_v25 = vpack.c.bf16 %v1742_v17, %v1741_v9  ;;  %v2332_v9 = vpack.c.bf16 %v1750_v51, %v1749_v50 }
 0x5b4   : > { %2317 = vmatpush3.bf16.msra.mxu0 %v2316_v25  ;;  %2353 = vmatpush3.bf16.msra.mxu1 %v2316_v25  ;;  %v1580_v25 = vmul.f32 %v3175_v63, %v3137_v49 }
 0x5b6   : > { %1664 = vrot.lane.b32.xlu1 %v1647_v26, %s2580_s14  ;;  %1311 = vperm.xlu0 %2495, %v3060_v12   ;;  %v1381_v12 = vmul.f32 %v1375_v29, %v3137_v49  ;;  %v2318_v26 = vpack.c.bf16 %v1760_v23, %v1759_v21  ;;  %v1761_v29 = vld [vmem:[%s3522_s1 + $0xd0] sm:$0xff] }
 0x5b8   : > { %2319 = vmatprep.subr.bf16.mxu0 %v2318_v26  ;;  %2355 = vmatprep.subr.bf16.mxu1 %v2318_v26 }
 0x5ba   : > { %1660 = vrot.lane.b32.xlu1 %v1645_v28, %s2580_s14  ;;  %1353 = vrot.lane.b32.xlu0 %v1339_v3, %s2579_s29  ;;  %v1743_v28 = vld [vmem:[%s3522_s1 + $0x40] sm:$0xff]  ;;  %v1744_v3 = vld [vmem:[%s3522_s1 + $0x48] sm:$0xff] }
 0x5bb   : > { %2498 = vset.pattern.permute.xlu0 %v2577_v13 }
 0x5be   : > { %1316 = vperm.xlu1 %2496, %v2502_v31   ;;  %1395 = vrot.lane.b32.xlu0 %v1382_v30, %s2580_s14 }
 0x5c2   : > { %1351 = vrot.lane.b32.xlu1 %v1338_v22, %s2579_s29  ;;  %1393 = vrot.lane.b32.xlu0 %v1381_v12, %s2580_s14  ;;  %v1762_v12 = vld [vmem:[%s3522_s1 + $0xd8] sm:$0xff]  ;;  %v2320_v22 = vpack.c.bf16 %v1744_v3, %v1743_v28 }
 0x5c3   : > { %2497 = vset.pattern.permute.xlu1 %v2577_v13  ;;  %v1340_v13 = vmul.f32 %v1335_v33, %v3169_v57  ;;  %v2322_v33 = vpack.c.bf16 %v1762_v12, %v1761_v29 }
 0x5c4   : > { %2321 = vmatpush3.bf16.msra.mxu0 %v2320_v22  ;;  %2357 = vmatpush3.bf16.msra.mxu1 %v2320_v22 }
 0x5c5   : > { %2323 = vmatprep.subr.bf16.mxu0 %v2322_v33  ;;  %2359 = vmatprep.subr.bf16.mxu1 %v2322_v33 }
 0x5c6   : > { %1349 = vrot.lane.b32.xlu1 %v1337_v24, %s2579_s29  ;;  %1359 = vrot.lane.b32.xlu0 %v1342_v14, %s2579_s29 }
 0x5ca   : > { %1397 = vrot.lane.b32.xlu1 %v1383_v34, %s2580_s14  ;;  %1399 = vrot.lane.b32.xlu0 %v1384_v43, %s2580_s14 }
 0x5ce   : > { %1401 = vrot.lane.b32.xlu0 %v1385_v36, %s2580_s14  ;;  %1355 = vrot.lane.b32.xlu1 %v1340_v13, %s2579_s29  ;;  %v1745_v13 = vld [vmem:[%s3522_s1 + $0x50] sm:$0xff]  ;;  %v1746_v36 = vld [vmem:[%s3522_s1 + $0x58] sm:$0xff] }
 0x5d2   : > { %1403 = vrot.lane.b32.xlu1 %v1386_v2, %s2580_s14  ;;  %s3476_s14 = scalar_lea.hbm %s3530_s9, %s2205_s23 }
 0x5d6   : > { %1357 = vrot.lane.b32.xlu1 %v1341_v16, %s2579_s29  ;;  %v2324_v16 = vpack.c.bf16 %v1746_v36, %v1745_v13  ;;  %v1445_v36 = vmul.f32 %v3283_v53, %v3189_v8  ;;  %s3480_s29 = scalar_lea.sflag [#allocation4], %s323_s24 }
 0x5d8   : > { %2325 = vmatpush3.bf16.msra.mxu0 %v2324_v16  ;;  %2361 = vmatpush3.bf16.msra.mxu1 %v2324_v16  ;;  %v1444_v16 = vmul.f32 %v3283_v53, %v3140_v59 }
 0x5fc   : > { %v3289_v62 = vpop.permute.xlu1 %1606  ;;  %v3291_v1 = vpop.permute.xlu0 %1466 }
 0x600   : > { %v3293_v6 = vpop.permute.xlu1 %1654  ;;  %v3295_v7 = vpop.permute.xlu0 %1514 }
 0x604   : > { %v1471_v30 = vpop.permute.xlu1 %1470  ;;  %v1609_v31 = vpop.permute.xlu0 %1608 }
 0x605   : > { %v1490_v58 = vadd.f32 %v1471_v30, %v3167_v56  ;;  %v1764_v56 = vld [vmem:[%s3522_s1 + $0xe8] sm:$0xff]  ;;  %v1618_v26 = vsel %vm389_vm3, %v3289_v62, %v1609_v31  ;;  %v1695_v62 = vsel %vm571_vm5, %v3287_v55, %v3285_v11 }
 0x606   : > { %v2326_v42 = vpack.c.bf16 %v1764_v56, %v1763_v37  ;;  %v1628_v33 = vadd.f32 %v1618_v26, %v1580_v25 }
 0x608   : > { %v1611_v14 = vpop.permute.xlu1 %1610  ;;  %v1517_v24 = vpop.permute.xlu0 %1516  ;;  %2327 = vmatprep.subr.bf16.mxu0 %v2326_v42  ;;  %2363 = vmatprep.subr.bf16.mxu1 %v2326_v42 }
 0x609   : > { %v1619_v39 = vsel %vm389_vm3, %v1609_v31, %v1611_v14  ;;  %2329 = vmatpush3.bf16.msra.mxu0 %v2328_v60  ;;  %2365 = vmatpush3.bf16.msra.mxu1 %v2328_v60  ;;  %v1630_v17 = vadd.f32 %v1611_v14, %v3179_v5 }
 0x60a   : > { %2331 = vmatprep.subr.bf16.mxu0 %v2330_v27  ;;  %v1629_v15 = vadd.f32 %v1619_v39, %v1581_v46  ;;  %2367 = vmatprep.subr.bf16.mxu1 %v2330_v27  ;;  %v1585_v39 = vmul.f32 %v3281_v52, %v3189_v8  ;;  %v1443_v27 = vmul.f32 %v3283_v53, %v3169_v57 }
 0x60b   : > { %v1583_v8 = vmul.f32 %v3281_v52, %v3169_v57 }
 0x60c   : > { %v1519_v34 = vpop.permute.xlu1 %1518  ;;  %v1657_v43 = vpop.permute.xlu0 %1656 }
 0x60d   : > { %v1538_v2 = vadd.f32 %v1519_v34, %v1490_v58  ;;  %v1527_v28 = vsel %vm412_vm4, %v1517_v24, %v1519_v34  ;;  %2333 = vmatpush3.bf16.msra.mxu0 %v2332_v9  ;;  %2369 = vmatpush3.bf16.msra.mxu1 %v2332_v9  ;;  %v1666_v63 = vsel %vm412_vm4, %v3293_v6, %v1657_v43 }
 0x60e   : > { %v1676_v31 = vadd.f32 %v1666_v63, %v1628_v33 }
 0x60f   : > { %1552 = vrot.lane.b32.xlu1 %v1538_v2, %s3537_s21 }
 0x610   : > { %v1659_v19 = vpop.permute.xlu1 %1658  ;;  %v3341_v44 = vpop.permute.xlu0 %1472  ;;  %v1699_v6 = vmul.f32 %v3287_v55, %v1676_v31 }
 0x611   : > { %v1667_v4 = vsel %vm412_vm4, %v1657_v43, %v1659_v19  ;;  %v1678_v29 = vadd.f32 %v1659_v19, %v1630_v17 }
 0x612   : > { %v1677_v3 = vadd.f32 %v1667_v4, %v1629_v15 }
 0x614   : > { %v1469_v41 = vpop.permute.xlu1 %1468  ;;  %v1475_v48 = vpop.permute.xlu0 %1474  ;;  %v1700_v14 = vmul.f32 %v1695_v62, %v1677_v3 }
 0x615   : > { %v1478_v18 = vsel %vm389_vm3, %v3291_v1, %v1469_v41  ;;  %v1479_v54 = vsel %vm389_vm3, %v1469_v41, %v1471_v30  ;;  %v1526_v1 = vsel %vm412_vm4, %v3295_v7, %v1517_v24  ;;  %v2503_v7 = vld [vmem:[%s2724_s27] sm:$0xff]  ;;  %v1701_v24 = vmul.f32 %v3285_v11, %v1678_v29 }
 0x616   : > { %v1488_v21 = vadd.f32 %v1478_v18, %v1440_v20  ;;  %v1489_v23 = vadd.f32 %v1479_v54, %v1441_v38  ;;  %2002 = vmatmul.mubr.f32.vlgmr.msra.gmra.mrb[4].mxu1 %v2503_v7  ;;  %v1480_v47 = vsel %vm389_vm3, %v3341_v44, %v1475_v48 }
 0x617   : > { %v1491_v44 = vadd.f32 %v1480_v47, %v1443_v27 }
 0x618   : > { %v1536_v30 = vadd.f32 %v1526_v1, %v1488_v21  ;;  %v1537_v5 = vadd.f32 %v1527_v28, %v1489_v23  ;;  %v1613_v12 = vpop.permute.xlu1 %1612  ;;  %v1615_v22 = vpop.permute.xlu0 %1614 }
 0x619   : > { %v1620_v50 = vsel %vm389_vm3, %v1613_v12, %v1615_v22 }
 0x61a   : > { %1550 = vrot.lane.b32.xlu0 %v1537_v5, %s3537_s21  ;;  %1548 = vrot.lane.b32.xlu1 %v1536_v30, %s3537_s21  ;;  %v1631_v54 = vadd.f32 %v1620_v50, %v1583_v8 }
 0x61c   : > { %v1477_v58 = vpop.permute.xlu1 %1476  ;;  %v1523_v34 = vpop.permute.xlu0 %1522 }
 0x61d   : > { %v1481_v2 = vsel %vm389_vm3, %v1475_v48, %v1477_v58  ;;  %v1493_v37 = vadd.f32 %v1477_v58, %v1445_v36 }
 0x61e   : > { %1715 = vrot.lane.b32.xlu1 %v1701_v24, %s3538_s17  ;;  %1713 = vrot.lane.b32.xlu0 %v1700_v14, %s3538_s17  ;;  %v1492_v56 = vadd.f32 %v1481_v2, %v1444_v16 }
 0x620   : > { %v1617_v43 = vpop.permute.xlu1 %1616  ;;  %v1663_v13 = vpop.permute.xlu0 %1662 }
 0x621   : > { %v1621_v0 = vsel %vm389_vm3, %v1615_v22, %v1617_v43  ;;  %v1633_v41 = vadd.f32 %v1617_v43, %v1585_v39 }
 0x622   : > { %1711 = vrot.lane.b32.xlu0 %v1699_v6, %s3538_s17  ;;  %v1632_v46 = vadd.f32 %v1621_v0, %v1584_v45  ;;  %v2193_v6 = vld [vmem:[%s3523_s2 + $0x4] ss:$8 sm:$0x3] }
 0x623   : > { %v1425_v36 = vrot.slane %v2193_v6, %v2769_v35 }
 0x624   : > { %v1525_v42 = vpop.permute.xlu1 %1524  ;;  %v1521_v19 = vpop.permute.xlu0 %1520 }
 0x625   : > { %v1529_v60 = vsel %vm412_vm4, %v1523_v34, %v1525_v42  ;;  %v1541_v32 = vadd.f32 %v1525_v42, %v1493_v37  ;;  %v1528_v38 = vsel %vm412_vm4, %v1521_v19, %v1523_v34 }
 0x626   : > { %v1540_v20 = vadd.f32 %v1529_v60, %v1492_v56  ;;  %v1539_v4 = vadd.f32 %v1528_v38, %v1491_v44 }
 0x627   : > { %1558 = vrot.lane.b32.xlu0 %v1541_v32, %s3537_s21 }
 0x628   : > { %v1665_v48 = vpop.permute.xlu1 %1664  ;;  %1556 = vrot.lane.b32.xlu1 %v1540_v20, %s3537_s21 }
 0x629   : > { %v1669_v51 = vsel %vm412_vm4, %v1663_v13, %v1665_v48  ;;  %v1681_v18 = vadd.f32 %v1665_v48, %v1633_v41 }
 0x62a   : > { %v1680_v53 = vadd.f32 %v1669_v51, %v1632_v46 }
 0x62b   : > { %v1704_v21 = vmul.f32 %v3285_v11, %v1681_v18 }
 0x62c   : > { %v1703_v9 = vmul.f32 %v1695_v62, %v1680_v53  ;;  %v1661_v15 = vpop.permute.xlu1 %1660  ;;  %1554 = vrot.lane.b32.xlu1 %v1539_v4, %s3537_s21 }
 0x62d   : > { %v1668_v17 = vsel %vm412_vm4, %v1661_v15, %v1663_v13 }
 0x62e   : > { %v1679_v23 = vadd.f32 %v1668_v17, %v1631_v54  ;;  %1719 = vrot.lane.b32.xlu0 %v1703_v9, %s3538_s17 }
 0x630   : > { %v1702_v25 = vmul.f32 %v3287_v55, %v1679_v23  ;;  %1721 = vrot.lane.b32.xlu1 %v1704_v21, %s3538_s17 }
 0x632   : > { %1717 = vrot.lane.b32.xlu0 %v1702_v25, %s3538_s17  ;;  %s2602_s17 = smov [#allocation3]  }
 0x633   : > { %s2508_s27 = sshll.u32 %s2602_s17, 4  ;;  %s2509_s27 = int_to_ptr.vmem [resolvable:$false] %s2508_s27 }
 0x634   : > { %s2510_s21 = scalar_lea.vmem %s2509_s27, 512  ;;  %p2511_p0 = scmp.lt.s32.totalorder %s3478_s16, %s2509_s27 }
 0x635   : > { %v1312_v26 = vpop.permute.xlu0 %1311  ;;  %p2512_p1 = scmp.lt.s32.totalorder %s2510_s21, %s2504_s13 }
 0x636   : > { %v1320_v55 = vmul.f32 %v1312_v26, %v3133_v61  ;;  %v1319_v14 = vmul.f32 %v3137_v49, %v1312_v26  ;;  %v1421_v49 = vrot.slane %v2193_v6, %v2780_v40  ;;  %v1843_v6 = vld [vmem:[%s3528_s7 + $0x8] sm:$0xff] }
 0x637   : > { %p2513_p2 = por %p2512_p1, %p2511_p0 }
 0x639   : > { %v1354_v28 = vpop.permute.xlu0 %1353  ;;  %p2514_p3 = pnand %p2513_p2, %p2507_p13 }
 0x63d   : > { %v1317_v52 = vpop.permute.xlu1 %1316  ;;  %v1396_v29 = vpop.permute.xlu0 %1395 }
 0x63e   : > { %v1322_v44 = vmul.f32 %v1317_v52, %v3140_v59  ;;  %v1321_v41 = vmul.f32 %v3169_v57, %v1317_v52 }
 0x641   : > { %v1352_v1 = vpop.permute.xlu1 %1351  ;;  %v1394_v5 = vpop.permute.xlu0 %1393 }
 0x642   : > { %v1362_v62 = vsel %vm389_vm3, %v1352_v1, %v1354_v28  ;;  %v1405_v61 = vsel %vm412_vm4, %v1394_v5, %v1396_v29  ;;  %v1842_v5 = vld [vmem:[%s3528_s7] sm:$0xff] }
 0x643   : > { %v1370_v24 = vadd.f32 %v1362_v62, %v1320_v55  ;;  %v1845_v62 = vld [vmem:[%s3525_s4 + $0x8] sm:$0xff] }
 0x644   : > { %1853 = vperm.xlu0 %2498, %v1845_v62  }
 0x645   : > { %v1350_v3 = vpop.permute.xlu1 %1349  ;;  %v1360_v22 = vpop.permute.xlu0 %1359 }
 0x646   : > { %v1361_v7 = vsel %vm389_vm3, %v1350_v3, %v1352_v1 }
 0x647   : > { %v1369_v43 = vadd.f32 %v1361_v7, %v1319_v14 }
 0x648   : > { %2500 = vset.pattern.permute.xlu0 %v2574_v10 }
 0x649   : > { %v1398_v30 = vpop.permute.xlu1 %1397  ;;  %v1400_v63 = vpop.permute.xlu0 %1399  ;;  %v1413_v56 = vadd.f32 %v1405_v61, %v1369_v43 }
 0x64a   : > { %v1406_v31 = vsel %vm412_vm4, %v1396_v29, %v1398_v30 }
 0x64b   : > { %v1414_v13 = vadd.f32 %v1406_v31, %v1370_v24  ;;  %v1428_v45 = vmul.f32 %v1421_v49, %v1413_v56 }
 0x64d   : > { %v1356_v12 = vpop.permute.xlu1 %1355  ;;  %v1402_v58 = vpop.permute.xlu0 %1401  ;;  %v1429_v42 = vmul.f32 %v1425_v36, %v1414_v13 }
 0x64e   : > { %v1407_v18 = vsel %vm412_vm4, %v1400_v63, %v1402_v58  ;;  %v2008_v63 = vld [vmem:[%s3529_s8 + $0x8] sm:$0xff] }
 0x651   : > { %v1404_v11 = vpop.permute.xlu1 %1403 }
 0x652   : > { %v1408_v8 = vsel %vm412_vm4, %v1402_v58, %v1404_v11  ;;  %v2007_v11 = vld [vmem:[%s3529_s8] sm:$0xff] }
 0x653   : > { %2295 = vmatprep.mubr.msk.f32.mxu1 %vm609_vm8, %v2007_v11 }
 0x655   : > { %v1358_v33 = vpop.permute.xlu1 %1357 }
 0x656   : > { %v1364_v20 = vsel %vm389_vm3, %v1358_v33, %v1360_v22  ;;  %v1363_v46 = vsel %vm389_vm3, %v1356_v12, %v1358_v33  ;;  %v1844_v33 = vld [vmem:[%s3525_s4] sm:$0xff] }
 0x657   : > { %v1372_v48 = vadd.f32 %v1364_v20, %v1322_v44  ;;  %v1371_v50 = vadd.f32 %v1363_v46, %v1321_v41  ;;  %1848 = vperm.xlu1 %2497, %v1844_v33  }
 0x659   : > { %v1416_v4 = vadd.f32 %v1408_v8, %v1372_v48  ;;  %v1415_v54 = vadd.f32 %v1407_v18, %v1371_v50 }
 0x65b   : > { %v1431_v59 = vmul.f32 %v1425_v36, %v1416_v4  ;;  %v1430_v57 = vmul.f32 %v1421_v49, %v1415_v54  ;;  %2499 = vset.pattern.permute.xlu1 %v2574_v10 }
 0x65c   : > { %2010 = vperm.xlu1 %2499, %v1844_v33  }
 0x660   : > { %2014 = vperm.xlu1 %2499, %v1845_v62  }
 0x681   : > { %v1553_v34 = vpop.permute.xlu1 %1552 }
 0x68c   : > { %v1549_v2 = vpop.permute.xlu1 %1548  ;;  %v1551_v16 = vpop.permute.xlu0 %1550 }
 0x68d   : > { %v1561_v37 = vsel %vm496_vm6, %v1551_v16, %v1553_v34  ;;  %v1560_v60 = vsel %vm496_vm6, %v1549_v2, %v1551_v16 }
 0x68e   : > { %v1569_v19 = vadd.f32 %v1561_v37, %v1429_v42  ;;  %v1568_v35 = vadd.f32 %v1560_v60, %v1428_v45 }
 0x690   : > { %v1716_v47 = vpop.permute.xlu1 %1715  ;;  %v1714_v0 = vpop.permute.xlu0 %1713 }
 0x691   : > { %v1724_v32 = vsel %vm588_vm7, %v1714_v0, %v1716_v47 }
 0x692   : > { %v1732_v39 = vadd.f32 %v1724_v32, %v1569_v19 }
 0x694   : > { %1831 = vmatprep.mubr.f32.mxu0 %v1732_v39  ;;  %v1712_v27 = vpop.permute.xlu0 %1711 }
 0x695   : > { %v1723_v38 = vsel %vm588_vm7, %v1712_v27, %v1714_v0 }
 0x696   : > { %v1731_v40 = vadd.f32 %v1723_v38, %v1568_v35 }
 0x698   : > { %1832 = vmatmul.mubr.f32.vlgmr.msra.gmra.mrb[4].mxu0 %v1731_v40 }
 0x699   : > { %v1559_v53 = vpop.permute.xlu0 %1558 }
 0x69a   : > { %v1557_v51 = vpop.permute.xlu1 %1556 }
 0x69b   : > { %v1563_v15 = vsel %vm496_vm6, %v1557_v51, %v1559_v53 }
 0x69c   : > { %v1571_v23 = vadd.f32 %v1563_v15, %v1431_v59 }
 0x69e   : > { %v1555_v9 = vpop.permute.xlu1 %1554 }
 0x69f   : > { %v1562_v21 = vsel %vm496_vm6, %v1555_v9, %v1557_v51 }
 0x6a0   : > { %v1720_v17 = vpop.permute.xlu0 %1719  ;;  %v1570_v26 = vadd.f32 %v1562_v21, %v1430_v57 }
 0x6a2   : > { %v1722_v25 = vpop.permute.xlu1 %1721 }
 0x6a3   : > { %v1726_v52 = vsel %vm588_vm7, %v1720_v17, %v1722_v25 }
 0x6a4   : > { %v1734_v1 = vadd.f32 %v1726_v52, %v1571_v23  ;;  %v1718_v28 = vpop.permute.xlu0 %1717 }
 0x6a5   : > { %v1725_v3 = vsel %vm588_vm7, %v1718_v28, %v1720_v17 }
 0x6a6   : > { %v1733_v29 = vadd.f32 %v1725_v3, %v1570_v26  ;;  %1836 = vmatprep.mubr.f32.mxu0 %v1734_v1 }
 0x6a8   : > { %1837 = vmatmul.mubr.f32.gmra.mrb[6].mxu0 %v1733_v29 }
 0x6a9   : > { %2290 = vmatprep.mubr.msk.f32.mxu0 %vm1179_vm9, %v1842_v5 }
 0x6c3   : > { %v1854_v2 = vpop.permute.xlu0 %1853 }
 0x6d6   : > { %v1849_v13 = vpop.permute.xlu1 %1848 }
 0x6db   : > { %v2011_v36 = vpop.permute.xlu1 %2010 }
 0x6df   : > { %v2015_v49 = vpop.permute.xlu1 %2014 }
 0x6e9   : > { %v2280_v30 = vpop.f32.mrb[4].mxu1 }
 0x6ea   : > { %v2281_v12 = vpop.f32.mrb[5].mxu1 }
 0x6eb   : > { %v2282_v22 = vadd.f32 %v2281_v12, %v2280_v30 }
 0x6ed   : > { %2293 = vmatprep.subr.mxu1 %v2282_v22 }
 0x6ee   : > { %2294 = vmatpush3.msra.mxu1 %v2282_v22 }
 0x6ef   : > { %2296 = vmatmul.mubr.msk.f32.vlgmr.msra.gmra.mrb[6].mxu1 %vm609_vm8, %v2008_v63 }
 0x76b   : > { %v2238_v55 = vpop.f32.mrb[4].mxu0 }
 0x76c   : > { %v2239_v7 = vpop.f32.mrb[5].mxu0 }
 0x76d   : > { %v2240_v31 = vadd.f32 %v2239_v7, %v2238_v55 }
 0x77b   : > { %v2241_v14 = vpop.f32.mrb[6].mxu0 }
 0x77c   : > { %v2242_v24 = vpop.f32.mrb[7].mxu0 }
 0x77d   : > { %v2243_v58 = vadd.f32 %v2242_v24, %v2241_v14 }
 0x77f   : > { %v2334_v34 = vpack.c.bf16 %v2243_v58, %v2240_v31 }
 0x781   : > { %2335 = vmatprep.subr.bf16.mxu0 %v2334_v34 }
 0x782   : > { %2337 = vmatpush3.bf16.msra.mxu0 %v2334_v34 }
 0x785   : > { %2291 = vmatmul.mubr.msk.f32.vlgmr.msra.gmra.mrb[8].mxu0 %vm1179_vm9, %v1843_v6 }
 0x7c2   : > { %v2297_v43 = vpop.f32.mrb[6].mxu1 }
 0x7c3   : > { %v2089_v10 = vpop.f32.mrb[7].mxu1 }
 0x858   : > { %v2292_v16 = vpop.f32.mrb[8].mxu0 }
 0x859   : > { %v1928_v61 = vpop.f32.mrb[9].mxu0  ;;  %v1934_v37 = vadd.f32 %v2292_v16, %v1854_v2 }
 0x85a   : > { %v1929_v56 = vadd.f32 %v1928_v61, %v1849_v13 }
 0x85b   : > { %v2371_v42 = vadd.f32 %v2015_v49, %v1934_v37 }
 0x85c   : > { %v2374_v19 = vadd.f32 %v2011_v36, %v1929_v56 }
 0x85d   : > { %v2372_v47 = vadd.f32 %v2371_v42, %v2297_v43 }
 0x85e   : > { %v2375_v0 = vadd.f32 %v2374_v19, %v2089_v10 }
 0x85f   : > { %2102 = vst.msk [vmem:[%s325_s26 + $0x8] sm:$0xff] %vm2100_vm10, %v2372_v47 }
 0x860   : > { %2101 = vst.msk [vmem:[%s325_s26] sm:$0xff] %vm2100_vm10, %v2375_v0 }
 0x861   : > { %2517 = shalt.err (!%p2514_p3)
}
 0x862   : > { %s2518_s24 = scalar_lea.hbm %s3476_s14, 256  ;;  %s2522_s23 = scalar_lea.hbm %s3530_s9, 512 }
 0x863   : > { %p2519_p4 = scmp.ne.s32.totalorder %s3476_s14, %s2518_s24  ;;  %p2523_p9 = scmp.lt.u32.totalorder %s3476_s14, %s3530_s9 }
 0x864   : > { %p2524_p10 = scmp.lt.u32.totalorder %s2522_s23, %s2518_s24  ;;  %p2526_p12 = scmp.lt.u32.totalorder %s2518_s24, %s3476_s14 }
 0x865   : > { %p2520_p7 = pnand %p2519_p4, %p2693_p5 }
 0x866   : > { %p2525_p11 = por %p2524_p10, %p2523_p9 }
 0x867   : > { %p2521_p8 = pneg %p2520_p7 }
 0x868   : > { %p2527_p13 = por %p2526_p12, %p2525_p11 }
 0x86a   : > { %p2528_p0 = pnand %p2527_p13, %p2521_p8 }
 0x86c   : > { %2531 = shalt.err (!%p2528_p0)
}
 0x86d   : > { %s2603_s13 = smov 128   ;;  %s2604_s17 = smov 8  }
 0x86e   : > { %2376 = dma.vmem_to_hbm [thread:$0]  (%p2693_p5), %s3478_s16, 256, %s3476_s14, %s3480_s29, %s2603_s13, %s2603_s13, %s2604_s17  }
 0x86f PF: > { %p2382_p1 = scmp.ge.s32.totalorder %s2566_s12, 2  ;;  %s2132_s27 = sand.u32 1, %s2554_s30  }
 0x870   : > { %s2133_s21 = scalar_lea.sflag [#allocation4], %s2132_s27 }
 0x871   : > { %p2379_p2 = pnand %p2382_p1, %p2697_p6 }
 0x873   : > { %2549 = dma.done.wait (!%p2379_p2), %s2133_s21, 256  }
 0x874   : > { %2551 = vsyncadd (!%p2379_p2), %s2133_s21, 4294967040  ;;  %p19_p3 = scmp.ge.s32.totalorder %s2680_s15, 4   ;;  %s3539_s30 = smov %s2558_s10 }
 0x875   : > { %s3540_s10 = smov %s2562_s11  ;;  %s3541_s11 = smov %s2691_s18 }
 0x876   : > { %s3542_s12 = smov %s2680_s15  ;;  %21 = sbr.rel (!%p19_p3) target bundleno = 3 (0x3), region = 96 }
 0x87d   :  { %2138 = vsyncpa [#allocation4], 1 }
 0x87e   :  { %2140 = vsyncpa [#allocation4 + $0x1], 1 }

</bundles_post_ra>
